<compile_context>
chip_gen: v6e
topology: v6e:2x2x1
jax: 0.10.0
libtpu: 0.0.40
codegen_flags: <defaults>
</compile_context>

<pallas_src>
import time

import jax
import jax.numpy as jnp
from jax.experimental import pallas as pl
from jax.experimental.pallas import tpu as pltpu

# ----------------------------- model config (small, synthetic) ---------------
B = 2            # batch
S = 8            # sequence length
H = 32           # hidden size
NH = 4           # attention heads
HD = H // NH     # head dim
P = 4            # pre_seq_len (prefix length)
P_PAD = 8        # prefix padded to a sublane-aligned 8 rows (pad keys masked)
V = 64           # vocab size
V_PAD = 128      # vocab padded so the only HBM store is lane-dense (128 wide)
FFN = 4 * H      # MLP inner size (=128, already lane-dense)
R = B * S        # folded batch*seq rows handled in one grid step
T_ALL = B * (P_PAD + S)   # total key length (prefix and seq keys of BOTH batches)
NUM_LAYERS = 1   # synthetic single GLM block
ALPHA = (2.0 * NUM_LAYERS) ** 0.5   # ChatGLM residual scaling

# rows of the packed hidden-sized vector table handed to the kernel
(_LN1_G, _LN1_B, _LN2_G, _LN2_B, _LNF_G, _LNF_B,
 _B_O, _B_4HH, _B_Q, _B_QR, _B_K, _B_KR, _B_V) = range(13)
NVEC = 16        # padded row count (sublane-aligned)

# slots of the stacked [5, H, H] projection-weight operand
_WQ, _WQR, _WK, _WKR, _WV = range(5)


# ----------------------------- fused Pallas kernel ---------------------------
def _fused_decoder_kernel(x_ref, cos_ref, sin_ref, mask_ref, pk_ref, pv_ref,
                          nv_ref, w5_ref, wo_ref, wh4h_ref, bh4h_ref,
                          w4hh_ref, wlm_ref, o_ref):
    """One prefix-tuned GLM decoder step for the WHOLE folded batch.

    All intermediates stay in VMEM/vregs; the only HBM store is the padded,
    lane-dense [R, 128] logits block.  MXU inputs are bf16 (fp32 accumulation);
    VPU/EUP math (LayerNorm, softmax, GELU, residuals) stays fp32.
    """
    f32, bf16 = jnp.float32, jnp.bfloat16

    x = x_ref[...]           # [R, H]      fp32 token embeddings (batch folded)
    cos = cos_ref[...]       # [R, H]      RoPE tables, pre-tiled per head+batch
    sin = sin_ref[...]       # [R, H]
    mask = mask_ref[...]     # [R, T_ALL]  additive mask (causal + prefix pad +
                             #             cross-batch blocking), 0 / -1e30
    nv = nv_ref[...]         # [NVEC, H]   packed LN gains/biases + proj biases

    def row(i):              # [1, H] broadcast row from the packed table
        return nv[i:i + 1, :]

    def layer_norm(v, g, b):
        mu = jnp.mean(v, axis=-1, keepdims=True)
        var = jnp.mean((v - mu) ** 2, axis=-1, keepdims=True)
        return (v - mu) * jax.lax.rsqrt(var + 1e-5) * row(g) + row(b)

    # ---- LN1 + Q/K/V projections (plus pre-rotated Q/K copies) --------------
    ln1 = layer_norm(x, _LN1_G, _LN1_B)                         # [R, H]
    ln1_bf = ln1.astype(bf16)

    def proj(w_idx, b_idx):  # [R, H] = [16, 32] @ [32, 32]  (MXU, fp32 acc)
        return (jnp.dot(ln1_bf, w5_ref[w_idx], preferred_element_type=f32)
                + row(b_idx))

    q_lin = proj(_WQ, _B_Q)       # 1/sqrt(HD) scale folded into weights/bias
    q_rot = proj(_WQR, _B_QR)     # rotate-half pre-baked into weight columns
    k_lin = proj(_WK, _B_K)
    k_rot = proj(_WKR, _B_KR)
    v_lin = proj(_WV, _B_V)

    # RoPE applied ONCE to the full [R, H] slabs (no per-head rotation work).
    # TODO(synk): ChatGLM-6B uses 2D rotary on half the head dim; standard RoPE here.
    q = q_lin * cos + q_rot * sin                               # [R, H]
    k = k_lin * cos + k_rot * sin                               # [R, H]

    # ---- head-major layout: one einshape per tensor (no per-head slicing) ----
    q3 = pltpu.einshape("rnd->nrd", q.reshape(R, NH, HD))       # [NH, R, HD]
    k3 = pltpu.einshape("rnd->nrd", k.reshape(R, NH, HD))       # [NH, R, HD]
    v3 = pltpu.einshape("rnd->nrd", v_lin.reshape(R, NH, HD))   # [NH, R, HD]

    # Prepend the batch-tiled, sublane-aligned (P_PAD=8) prefix KV: ONE aligned
    # concat along the key axis per tensor.
    k_full = jnp.concatenate([pk_ref[...], k3], axis=1)         # [NH, T_ALL, HD]
    v_full = jnp.concatenate([pv_ref[...], v3], axis=1)         # [NH, T_ALL, HD]

    # ---- attention: single einsum batched over heads (batch lives in the key
    # axis; the mask blocks cross-batch attention, pad-prefix keys and future).
    scores = jnp.einsum("nqd,nkd->nqk", q3.astype(bf16), k_full.astype(bf16),
                        preferred_element_type=f32)             # [NH, R, T_ALL]
    scores = scores + mask[None, :, :]
    m = jnp.max(scores, axis=-1, keepdims=True)
    p = jnp.exp(scores - m)
    p = p * pl.reciprocal(jnp.sum(p, axis=-1, keepdims=True), approx=True)
    ctx = jnp.einsum("nqk,nkd->nqd", p.astype(bf16), v_full.astype(bf16),
                     preferred_element_type=f32)                # [NH, R, HD]
    attn = pltpu.einshape("nrd->rnd", ctx).reshape(R, H)        # [R, H]

    # ---- output projection + ChatGLM scaled residual --------------------------
    attn_out = jnp.dot(attn.astype(bf16), wo_ref[...],
                       preferred_element_type=f32) + row(_B_O)
    h1 = ln1 * ALPHA + attn_out

    # ---- MLP (ChatGLM gelu_impl == tanh-approx GELU) ---------------------------
    ln2 = layer_norm(h1, _LN2_G, _LN2_B)
    mid = jax.nn.gelu(jnp.dot(ln2.astype(bf16), wh4h_ref[...],
                              preferred_element_type=f32) + bh4h_ref[...],
                      approximate=True)                         # [R, FFN]
    mlp_out = jnp.dot(mid.astype(bf16), w4hh_ref[...],
                      preferred_element_type=f32) + row(_B_4HH)
    h2 = ln2 * ALPHA + mlp_out

    # ---- final LN + pre-transposed, vocab-padded LM head (no bias) -------------
    hf = layer_norm(h2, _LNF_G, _LNF_B)
    logits = jnp.dot(hf.astype(bf16), wlm_ref[...],
                     preferred_element_type=f32)                # [R, V_PAD]
    o_ref[...] = logits                                         # lane-dense store


def fused_decoder_step(x, cos, sin, mask, params):
    """x: [B*S, H] fp32 embeddings -> padded logits [B*S, V_PAD] fp32."""
    return pl.pallas_call(
        _fused_decoder_kernel,
        out_shape=jax.ShapeDtypeStruct((R, V_PAD), jnp.float32),
        grid=(1,),   # batch folded -> single grid step; every block index is constant
        in_specs=[
            pl.BlockSpec((R, H), lambda i: (0, 0)),                  # x  (folded batch)
            pl.BlockSpec((R, H), lambda i: (0, 0)),                  # RoPE cos (tiled)
            pl.BlockSpec((R, H), lambda i: (0, 0)),                  # RoPE sin (tiled)
            pl.BlockSpec((R, T_ALL), lambda i: (0, 0)),              # additive mask
            pl.BlockSpec((NH, B * P_PAD, HD), lambda i: (0, 0, 0)),  # prefix K (padded)
            pl.BlockSpec((NH, B * P_PAD, HD), lambda i: (0, 0, 0)),  # prefix V (padded)
            pl.BlockSpec((NVEC, H), lambda i: (0, 0)),               # packed LN/bias vecs
            pl.BlockSpec((5, H, H), lambda i: (0, 0, 0)),            # wq/wqr/wk/wkr/wv (bf16)
            pl.BlockSpec((H, H), lambda i: (0, 0)),                  # w_o   (bf16)
            pl.BlockSpec((H, FFN), lambda i: (0, 0)),                # w_h4h (bf16)
            pl.BlockSpec((1, FFN), lambda i: (0, 0)),                # b_h4h
            pl.BlockSpec((FFN, H), lambda i: (0, 0)),                # w_4hh (bf16)
            pl.BlockSpec((H, V_PAD), lambda i: (0, 0)),              # w_lm  (bf16, padded)
        ],
        out_specs=pl.BlockSpec((R, V_PAD), lambda i: (0, 0)),
        # Single grid step -> no per-step pipeline overhead and no repeated
        # weight DMAs; "arbitrary" is accurate for a 1-step grid.
        compiler_params=pltpu.CompilerParams(
            dimension_semantics=("arbitrary",)),
    )(x, cos, sin, mask,
      params["prefix_k"], params["prefix_v"], params["norm_vecs"],
      params["w_qkv5"], params["w_o"], params["w_h4h"], params["b_h4h"],
      params["w_4hh"], params["w_lm"])


# ----------------------------- params ----------------------------------------
def _rotate_half_cols(w):
    """Rotate-half applied per head along the last (output-feature) axis."""
    w4 = w.reshape(*w.shape[:-1], NH, HD)
    lo, hi = w4[..., :HD // 2], w4[..., HD // 2:]
    return jnp.concatenate([-hi, lo], axis=-1).reshape(w.shape)


def init_params(key):
    ks = jax.random.split(key, 6)
    std = 0.02
    wte = jax.random.normal(ks[0], (V, H), jnp.float32) * std

    # prefix encoder (P-tuning-v2): Embedding(pre_seq_len, 2*hidden), kept fp32,
    # padded to P_PAD sublane-aligned rows and batch-tiled along the key axis.
    prefix_emb = jax.random.normal(ks[1], (P, 2 * H), jnp.float32) * std
    pk, pv = jnp.split(prefix_emb, 2, axis=-1)                   # [P, H] each

    def to_kernel_layout(pref):
        pref = pref.reshape(P, NH, HD).transpose(1, 0, 2)        # [NH, P, HD]
        pref = jnp.pad(pref, ((0, 0), (0, P_PAD - P), (0, 0)))   # [NH, P_PAD, HD]
        return jnp.tile(pref, (1, B, 1))                         # [NH, B*P_PAD, HD]

    prefix_k, prefix_v = to_kernel_layout(pk), to_kernel_layout(pv)

    # fused QKV weights, split + 1/sqrt(HD) scale folded into Q columns, plus
    # pre-rotated (rotate-half) Q/K copies so no rotation happens in-kernel.
    scale = 1.0 / (HD ** 0.5)
    w_qkv = jax.random.normal(ks[2], (H, 3 * H), jnp.float32) * std
    b_qkv = jnp.zeros((3 * H,), jnp.float32)
    wq = w_qkv[:, :H] * scale
    wk = w_qkv[:, H:2 * H]
    wv = w_qkv[:, 2 * H:]
    bq = b_qkv[:H] * scale
    bk = b_qkv[H:2 * H]
    bv = b_qkv[2 * H:]
    w_qkv5 = jnp.stack([wq, _rotate_half_cols(wq), wk, _rotate_half_cols(wk),
                        wv]).astype(jnp.bfloat16)                # [5, H, H]

    # packed hidden-sized vectors: LN gains/biases + projection biases
    norm_vecs = jnp.zeros((NVEC, H), jnp.float32)
    norm_vecs = (norm_vecs.at[_LN1_G].set(1.0)
                          .at[_LN2_G].set(1.0)
                          .at[_LNF_G].set(1.0)
                          .at[_B_Q].set(bq)
                          .at[_B_QR].set(_rotate_half_cols(bq))
                          .at[_B_K].set(bk)
                          .at[_B_KR].set(_rotate_half_cols(bk))
                          .at[_B_V].set(bv))

    # remaining matmul weights stored bf16 (MXU inputs); accumulation stays fp32
    w_o = (jax.random.normal(ks[3], (H, H), jnp.float32) * std).astype(jnp.bfloat16)
    w_h4h = (jax.random.normal(ks[4], (H, FFN), jnp.float32) * std).astype(jnp.bfloat16)
    w_4hh = (jax.random.normal(ks[5], (FFN, H), jnp.float32) * std).astype(jnp.bfloat16)
    b_h4h = jnp.zeros((1, FFN), jnp.float32)

    # LM head tied to wte: pre-transposed and zero-padded to a lane-dense width
    w_lm = jnp.zeros((H, V_PAD), jnp.bfloat16).at[:, :V].set(wte.T.astype(jnp.bfloat16))

    return {"wte": wte, "prefix_k": prefix_k, "prefix_v": prefix_v,
            "norm_vecs": norm_vecs, "w_qkv5": w_qkv5, "w_o": w_o,
            "w_h4h": w_h4h, "b_h4h": b_h4h, "w_4hh": w_4hh, "w_lm": w_lm}


# ----------------------------- forward ----------------------------------------
@jax.jit
def chat_forward(params, input_ids):
    """One prefix-tuned GLM decoder step; returns (greedy next tokens, logits)."""
    b, s = input_ids.shape

    # token embedding gather stays as a single XLA op; batch folded into rows.
    x = params["wte"][input_ids.reshape(-1)]                     # [B*S, H] fp32

    # RoPE tables pre-tiled over heads and batch (input-independent ->
    # constant-folded at jit time, then VMEM-resident in the kernel).
    pos = jnp.arange(s, dtype=jnp.float32)
    inv_freq = 1.0 / (10000.0 ** (jnp.arange(0, HD, 2, dtype=jnp.float32) / HD))
    freqs = pos[:, None] * inv_freq[None, :]                     # [S, HD/2]
    cos = jnp.tile(jnp.concatenate([jnp.cos(freqs)] * 2, axis=-1), (b, NH))  # [B*S, H]
    sin = jnp.tile(jnp.concatenate([jnp.sin(freqs)] * 2, axis=-1), (b, NH))

    # additive mask over the folded key axis [b0 prefix | b1 prefix | b0 seq | b1 seq]:
    # real prefix keys of the SAME batch always visible, pad-prefix keys never,
    # sequence keys causal within the same batch, cross-batch blocked.
    rows = jnp.arange(b * s)
    qb, qs = rows // s, rows % s
    keys = jnp.arange(T_ALL)
    is_pref = keys < b * P_PAD
    vis_pref = (keys // P_PAD == qb[:, None]) & (keys % P_PAD < P)
    seq = keys - b * P_PAD
    vis_seq = (seq // s == qb[:, None]) & (seq % s <= qs[:, None])
    visible = jnp.where(is_pref[None, :], vis_pref, vis_seq)
    mask = jnp.where(visible, 0.0, -1e30).astype(jnp.float32)    # [B*S, T_ALL]

    logits_pad = fused_decoder_step(x, cos, sin, mask, params)   # [B*S, V_PAD]
    logits = logits_pad.reshape(b, s, V_PAD)[:, :, :V]
    next_token = jnp.argmax(logits[:, -1, :], axis=-1)           # greedy "response" step
    return next_token, logits


if __name__ == "__main__":
    key = jax.random.PRNGKey(0)
    k_param, k_ids = jax.random.split(key)
    params = init_params(k_param)
    input_ids = jax.random.randint(k_ids, (B, S), 0, V, dtype=jnp.int32)

    # TODO(synk): tokenizer + autoregressive `model.chat` sampling loop are
    # host-side and not representable as a Pallas kernel; one greedy decoder
    # step stands in for the "response".
    start = time.time()
    next_tok, logits = chat_forward(params, input_ids)
    jax.block_until_ready((next_tok, logits))
    infer_time = round(time.time() - start, 3)

    assert next_tok.shape == (B,)
    assert logits.shape == (B, S, V)
    assert bool(jnp.all(jnp.isfinite(logits)))
    _ = infer_time  # mirrors the (response, infer_time) return of PtChat.forward
    print("KERNEL_OK")
</pallas_src>

<mosaic_0001>
module attributes {stable_mosaic.version = 11 : i64} {
  func.func @_fused_decoder_kernel(%arg0: i32, %arg1: memref<16x32xf32, #tpu.memory_space<vmem>>, %arg2: memref<16x32xf32, #tpu.memory_space<vmem>>, %arg3: memref<16x32xf32, #tpu.memory_space<vmem>>, %arg4: memref<16x32xf32, #tpu.memory_space<vmem>>, %arg5: memref<4x16x8xf32, #tpu.memory_space<vmem>>, %arg6: memref<4x16x8xf32, #tpu.memory_space<vmem>>, %arg7: memref<16x32xf32, #tpu.memory_space<vmem>>, %arg8: memref<5x32x32xbf16, #tpu.memory_space<vmem>>, %arg9: memref<32x32xbf16, #tpu.memory_space<vmem>>, %arg10: memref<32x128xbf16, #tpu.memory_space<vmem>>, %arg11: memref<1x128xf32, #tpu.memory_space<vmem>>, %arg12: memref<128x32xbf16, #tpu.memory_space<vmem>>, %arg13: memref<32x128xbf16, #tpu.memory_space<vmem>>, %arg14: memref<16x128xf32, #tpu.memory_space<vmem>>) attributes {dimension_semantics = [#tpu.dimension_semantics<arbitrary>], iteration_bounds = array<i64: 1>, scalar_prefetch = 0 : i64, scratch_operands = 0 : i64, tpu.core_type = #tpu.core_type<tc>, window_params = [{pipeline_mode = #tpu.pipeline_mode<synchronous>, transform_indices = @transform_0, window_bounds = array<i64: 16, 32>}, {pipeline_mode = #tpu.pipeline_mode<synchronous>, transform_indices = @transform_1, window_bounds = array<i64: 16, 32>}, {pipeline_mode = #tpu.pipeline_mode<synchronous>, transform_indices = @transform_2, window_bounds = array<i64: 16, 32>}, {pipeline_mode = #tpu.pipeline_mode<synchronous>, transform_indices = @transform_3, window_bounds = array<i64: 16, 32>}, {pipeline_mode = #tpu.pipeline_mode<synchronous>, transform_indices = @transform_4, window_bounds = array<i64: 4, 16, 8>}, {pipeline_mode = #tpu.pipeline_mode<synchronous>, transform_indices = @transform_5, window_bounds = array<i64: 4, 16, 8>}, {pipeline_mode = #tpu.pipeline_mode<synchronous>, transform_indices = @transform_6, window_bounds = array<i64: 16, 32>}, {pipeline_mode = #tpu.pipeline_mode<synchronous>, transform_indices = @transform_7, window_bounds = array<i64: 5, 32, 32>}, {pipeline_mode = #tpu.pipeline_mode<synchronous>, transform_indices = @transform_8, window_bounds = array<i64: 32, 32>}, {pipeline_mode = #tpu.pipeline_mode<synchronous>, transform_indices = @transform_9, window_bounds = array<i64: 32, 128>}, {pipeline_mode = #tpu.pipeline_mode<synchronous>, transform_indices = @transform_10, window_bounds = array<i64: 1, 128>}, {pipeline_mode = #tpu.pipeline_mode<synchronous>, transform_indices = @transform_11, window_bounds = array<i64: 128, 32>}, {pipeline_mode = #tpu.pipeline_mode<synchronous>, transform_indices = @transform_12, window_bounds = array<i64: 32, 128>}, {pipeline_mode = #tpu.pipeline_mode<synchronous>, transform_indices = @transform_13, window_bounds = array<i64: 16, 128>}]} {
    %c0 = arith.constant 0 : index
    %c0_0 = arith.constant 0 : index
    %0 = vector.load %arg1[%c0, %c0_0] : memref<16x32xf32, #tpu.memory_space<vmem>>, vector<16x32xf32>
    %c0_1 = arith.constant 0 : index
    %c0_2 = arith.constant 0 : index
    %1 = vector.load %arg2[%c0_1, %c0_2] : memref<16x32xf32, #tpu.memory_space<vmem>>, vector<16x32xf32>
    %c0_3 = arith.constant 0 : index
    %c0_4 = arith.constant 0 : index
    %2 = vector.load %arg3[%c0_3, %c0_4] : memref<16x32xf32, #tpu.memory_space<vmem>>, vector<16x32xf32>
    %c0_5 = arith.constant 0 : index
    %c0_6 = arith.constant 0 : index
    %3 = vector.load %arg4[%c0_5, %c0_6] : memref<16x32xf32, #tpu.memory_space<vmem>>, vector<16x32xf32>
    %c0_7 = arith.constant 0 : index
    %c0_8 = arith.constant 0 : index
    %4 = vector.load %arg7[%c0_7, %c0_8] : memref<16x32xf32, #tpu.memory_space<vmem>>, vector<16x32xf32>
    %cst = arith.constant dense<0.000000e+00> : vector<16xf32>
    %5 = vector.multi_reduction <add>, %0, %cst [1] : vector<16x32xf32> to vector<16xf32>
    %6 = vector.shape_cast %5 : vector<16xf32> to vector<16x1xf32>
    %cst_9 = arith.constant 3.200000e+01 : f32
    %7 = vector.broadcast %cst_9 : f32 to vector<16x1xf32>
    %8 = arith.divf %6, %7 : vector<16x1xf32>
    %9 = vector.broadcast %8 : vector<16x1xf32> to vector<16x32xf32>
    %10 = arith.subf %0, %9 : vector<16x32xf32>
    %11 = arith.mulf %10, %10 : vector<16x32xf32>
    %cst_10 = arith.constant dense<0.000000e+00> : vector<16xf32>
    %12 = vector.multi_reduction <add>, %11, %cst_10 [1] : vector<16x32xf32> to vector<16xf32>
    %13 = vector.shape_cast %12 : vector<16xf32> to vector<16x1xf32>
    %cst_11 = arith.constant 3.200000e+01 : f32
    %14 = vector.broadcast %cst_11 : f32 to vector<16x1xf32>
    %15 = arith.divf %13, %14 : vector<16x1xf32>
    %16 = vector.broadcast %8 : vector<16x1xf32> to vector<16x32xf32>
    %17 = arith.subf %0, %16 : vector<16x32xf32>
    %cst_12 = arith.constant 9.99999974E-6 : f32
    %18 = vector.broadcast %cst_12 : f32 to vector<16x1xf32>
    %19 = arith.addf %15, %18 : vector<16x1xf32>
    %20 = math.rsqrt %19 : vector<16x1xf32>
    %21 = vector.broadcast %20 : vector<16x1xf32> to vector<16x32xf32>
    %22 = arith.mulf %17, %21 : vector<16x32xf32>
    %23 = vector.extract_strided_slice %4 {offsets = [0, 0], sizes = [1, 32], strides = [1, 1]} : vector<16x32xf32> to vector<1x32xf32>
    %24 = vector.broadcast %23 : vector<1x32xf32> to vector<16x32xf32>
    %25 = arith.mulf %22, %24 : vector<16x32xf32>
    %26 = vector.extract_strided_slice %4 {offsets = [1, 0], sizes = [1, 32], strides = [1, 1]} : vector<16x32xf32> to vector<1x32xf32>
    %27 = vector.broadcast %26 : vector<1x32xf32> to vector<16x32xf32>
    %28 = arith.addf %25, %27 : vector<16x32xf32>
    %29 = arith.truncf %28 : vector<16x32xf32> to vector<16x32xbf16>
    %c0_13 = arith.constant 0 : index
    %c0_14 = arith.constant 0 : index
    %c0_15 = arith.constant 0 : index
    %30 = vector.load %arg8[%c0_13, %c0_14, %c0_15] : memref<5x32x32xbf16, #tpu.memory_space<vmem>>, vector<1x32x32xbf16>
    %31 = vector.shape_cast %30 : vector<1x32x32xbf16> to vector<32x32xbf16>
    %cst_16 = arith.constant dense<0.000000e+00> : vector<16x32xf32>
    %32 = tpu.matmul %29, %31, %cst_16 {dimension_numbers = #tpu.dot_dimension_numbers<[1], [0], [0], [1], [0, 0, 1, 1], [], []>} : vector<16x32xbf16>, vector<32x32xbf16>, vector<16x32xf32> -> vector<16x32xf32>
    %33 = vector.extract_strided_slice %4 {offsets = [8, 0], sizes = [1, 32], strides = [1, 1]} : vector<16x32xf32> to vector<1x32xf32>
    %34 = vector.broadcast %33 : vector<1x32xf32> to vector<16x32xf32>
    %35 = arith.addf %32, %34 : vector<16x32xf32>
    %c1 = arith.constant 1 : index
    %c0_17 = arith.constant 0 : index
    %c0_18 = arith.constant 0 : index
    %36 = vector.load %arg8[%c1, %c0_17, %c0_18] : memref<5x32x32xbf16, #tpu.memory_space<vmem>>, vector<1x32x32xbf16>
    %37 = vector.shape_cast %36 : vector<1x32x32xbf16> to vector<32x32xbf16>
    %cst_19 = arith.constant dense<0.000000e+00> : vector<16x32xf32>
    %38 = tpu.matmul %29, %37, %cst_19 {dimension_numbers = #tpu.dot_dimension_numbers<[1], [0], [0], [1], [0, 0, 1, 1], [], []>} : vector<16x32xbf16>, vector<32x32xbf16>, vector<16x32xf32> -> vector<16x32xf32>
    %39 = vector.extract_strided_slice %4 {offsets = [9, 0], sizes = [1, 32], strides = [1, 1]} : vector<16x32xf32> to vector<1x32xf32>
    %40 = vector.broadcast %39 : vector<1x32xf32> to vector<16x32xf32>
    %41 = arith.addf %38, %40 : vector<16x32xf32>
    %c2 = arith.constant 2 : index
    %c0_20 = arith.constant 0 : index
    %c0_21 = arith.constant 0 : index
    %42 = vector.load %arg8[%c2, %c0_20, %c0_21] : memref<5x32x32xbf16, #tpu.memory_space<vmem>>, vector<1x32x32xbf16>
    %43 = vector.shape_cast %42 : vector<1x32x32xbf16> to vector<32x32xbf16>
    %cst_22 = arith.constant dense<0.000000e+00> : vector<16x32xf32>
    %44 = tpu.matmul %29, %43, %cst_22 {dimension_numbers = #tpu.dot_dimension_numbers<[1], [0], [0], [1], [0, 0, 1, 1], [], []>} : vector<16x32xbf16>, vector<32x32xbf16>, vector<16x32xf32> -> vector<16x32xf32>
    %45 = vector.extract_strided_slice %4 {offsets = [10, 0], sizes = [1, 32], strides = [1, 1]} : vector<16x32xf32> to vector<1x32xf32>
    %46 = vector.broadcast %45 : vector<1x32xf32> to vector<16x32xf32>
    %47 = arith.addf %44, %46 : vector<16x32xf32>
    %c3 = arith.constant 3 : index
    %c0_23 = arith.constant 0 : index
    %c0_24 = arith.constant 0 : index
    %48 = vector.load %arg8[%c3, %c0_23, %c0_24] : memref<5x32x32xbf16, #tpu.memory_space<vmem>>, vector<1x32x32xbf16>
    %49 = vector.shape_cast %48 : vector<1x32x32xbf16> to vector<32x32xbf16>
    %cst_25 = arith.constant dense<0.000000e+00> : vector<16x32xf32>
    %50 = tpu.matmul %29, %49, %cst_25 {dimension_numbers = #tpu.dot_dimension_numbers<[1], [0], [0], [1], [0, 0, 1, 1], [], []>} : vector<16x32xbf16>, vector<32x32xbf16>, vector<16x32xf32> -> vector<16x32xf32>
    %51 = vector.extract_strided_slice %4 {offsets = [11, 0], sizes = [1, 32], strides = [1, 1]} : vector<16x32xf32> to vector<1x32xf32>
    %52 = vector.broadcast %51 : vector<1x32xf32> to vector<16x32xf32>
    %53 = arith.addf %50, %52 : vector<16x32xf32>
    %c4 = arith.constant 4 : index
    %c0_26 = arith.constant 0 : index
    %c0_27 = arith.constant 0 : index
    %54 = vector.load %arg8[%c4, %c0_26, %c0_27] : memref<5x32x32xbf16, #tpu.memory_space<vmem>>, vector<1x32x32xbf16>
    %55 = vector.shape_cast %54 : vector<1x32x32xbf16> to vector<32x32xbf16>
    %cst_28 = arith.constant dense<0.000000e+00> : vector<16x32xf32>
    %56 = tpu.matmul %29, %55, %cst_28 {dimension_numbers = #tpu.dot_dimension_numbers<[1], [0], [0], [1], [0, 0, 1, 1], [], []>} : vector<16x32xbf16>, vector<32x32xbf16>, vector<16x32xf32> -> vector<16x32xf32>
    %57 = vector.extract_strided_slice %4 {offsets = [12, 0], sizes = [1, 32], strides = [1, 1]} : vector<16x32xf32> to vector<1x32xf32>
    %58 = vector.broadcast %57 : vector<1x32xf32> to vector<16x32xf32>
    %59 = arith.addf %56, %58 : vector<16x32xf32>
    %60 = arith.mulf %35, %1 : vector<16x32xf32>
    %61 = arith.mulf %41, %2 : vector<16x32xf32>
    %62 = arith.addf %60, %61 : vector<16x32xf32>
    %63 = arith.mulf %47, %1 : vector<16x32xf32>
    %64 = arith.mulf %53, %2 : vector<16x32xf32>
    %65 = arith.addf %63, %64 : vector<16x32xf32>
    %66 = vector.shape_cast %62 : vector<16x32xf32> to vector<16x4x8xf32>
    %67 = tpu.transpose %66, [1, 0, 2] : vector<16x4x8xf32> -> vector<4x16x8xf32>
    %68 = vector.shape_cast %65 : vector<16x32xf32> to vector<16x4x8xf32>
    %69 = tpu.transpose %68, [1, 0, 2] : vector<16x4x8xf32> -> vector<4x16x8xf32>
    %70 = vector.shape_cast %59 : vector<16x32xf32> to vector<16x4x8xf32>
    %71 = tpu.transpose %70, [1, 0, 2] : vector<16x4x8xf32> -> vector<4x16x8xf32>
    %c0_29 = arith.constant 0 : index
    %c0_30 = arith.constant 0 : index
    %c0_31 = arith.constant 0 : index
    %72 = vector.load %arg5[%c0_29, %c0_30, %c0_31] : memref<4x16x8xf32, #tpu.memory_space<vmem>>, vector<4x16x8xf32>
    %73 = tpu.concatenate %72, %69 in 1 : vector<4x16x8xf32>, vector<4x16x8xf32> -> vector<4x32x8xf32>
    %c0_32 = arith.constant 0 : index
    %c0_33 = arith.constant 0 : index
    %c0_34 = arith.constant 0 : index
    %74 = vector.load %arg6[%c0_32, %c0_33, %c0_34] : memref<4x16x8xf32, #tpu.memory_space<vmem>>, vector<4x16x8xf32>
    %75 = tpu.concatenate %74, %71 in 1 : vector<4x16x8xf32>, vector<4x16x8xf32> -> vector<4x32x8xf32>
    %76 = arith.truncf %67 : vector<4x16x8xf32> to vector<4x16x8xbf16>
    %77 = arith.truncf %73 : vector<4x32x8xf32> to vector<4x32x8xbf16>
    "tpu.trace_start"() <{level = 10 : i32, message = "nqd,nkd->nqk"}> : () -> ()
    %cst_35 = arith.constant dense<0.000000e+00> : vector<4x16x32xf32>
    %78 = tpu.matmul %76, %77, %cst_35 {dimension_numbers = #tpu.dot_dimension_numbers<[2], [2], [1], [1], [0, 0, 0, 1, 1, 1], [0], [0]>} : vector<4x16x8xbf16>, vector<4x32x8xbf16>, vector<4x16x32xf32> -> vector<4x16x32xf32>
    "tpu.trace_stop"() : () -> ()
    %79 = vector.shape_cast %3 : vector<16x32xf32> to vector<1x16x32xf32>
    %80 = vector.broadcast %79 : vector<1x16x32xf32> to vector<4x16x32xf32>
    %81 = arith.addf %78, %80 : vector<4x16x32xf32>
    %cst_36 = arith.constant dense<0xFF800000> : vector<4x16xf32>
    %82 = vector.multi_reduction <maximumf>, %81, %cst_36 [2] : vector<4x16x32xf32> to vector<4x16xf32>
    %83 = vector.shape_cast %82 : vector<4x16xf32> to vector<4x16x1xf32>
    %84 = vector.broadcast %83 : vector<4x16x1xf32> to vector<4x16x32xf32>
    %85 = arith.subf %81, %84 : vector<4x16x32xf32>
    %86 = math.exp %85 : vector<4x16x32xf32>
    %cst_37 = arith.constant dense<0.000000e+00> : vector<4x16xf32>
    %87 = vector.multi_reduction <add>, %86, %cst_37 [2] : vector<4x16x32xf32> to vector<4x16xf32>
    %88 = vector.shape_cast %87 : vector<4x16xf32> to vector<4x16x1xf32>
    %89 = tpu.reciprocal %88 {approx = true} : vector<4x16x1xf32> -> vector<4x16x1xf32>
    %90 = vector.broadcast %89 : vector<4x16x1xf32> to vector<4x16x32xf32>
    %91 = arith.mulf %86, %90 : vector<4x16x32xf32>
    %92 = arith.truncf %91 : vector<4x16x32xf32> to vector<4x16x32xbf16>
    %93 = arith.truncf %75 : vector<4x32x8xf32> to vector<4x32x8xbf16>
    "tpu.trace_start"() <{level = 10 : i32, message = "nqk,nkd->nqd"}> : () -> ()
    %cst_38 = arith.constant dense<0.000000e+00> : vector<4x16x8xf32>
    %94 = tpu.matmul %92, %93, %cst_38 {dimension_numbers = #tpu.dot_dimension_numbers<[2], [1], [1], [2], [0, 0, 0, 1, 1, 2], [0], [0]>} : vector<4x16x32xbf16>, vector<4x32x8xbf16>, vector<4x16x8xf32> -> vector<4x16x8xf32>
    "tpu.trace_stop"() : () -> ()
    %95 = tpu.transpose %94, [1, 0, 2] : vector<4x16x8xf32> -> vector<16x4x8xf32>
    %96 = vector.shape_cast %95 : vector<16x4x8xf32> to vector<16x32xf32>
    %97 = arith.truncf %96 : vector<16x32xf32> to vector<16x32xbf16>
    %c0_39 = arith.constant 0 : index
    %c0_40 = arith.constant 0 : index
    %98 = vector.load %arg9[%c0_39, %c0_40] : memref<32x32xbf16, #tpu.memory_space<vmem>>, vector<32x32xbf16>
    %cst_41 = arith.constant dense<0.000000e+00> : vector<16x32xf32>
    %99 = tpu.matmul %97, %98, %cst_41 {dimension_numbers = #tpu.dot_dimension_numbers<[1], [0], [0], [1], [0, 0, 1, 1], [], []>} : vector<16x32xbf16>, vector<32x32xbf16>, vector<16x32xf32> -> vector<16x32xf32>
    %100 = vector.extract_strided_slice %4 {offsets = [6, 0], sizes = [1, 32], strides = [1, 1]} : vector<16x32xf32> to vector<1x32xf32>
    %101 = vector.broadcast %100 : vector<1x32xf32> to vector<16x32xf32>
    %102 = arith.addf %99, %101 : vector<16x32xf32>
    %cst_42 = arith.constant 1.41421354 : f32
    %103 = vector.broadcast %cst_42 : f32 to vector<16x32xf32>
    %104 = arith.mulf %28, %103 : vector<16x32xf32>
    %105 = arith.addf %104, %102 : vector<16x32xf32>
    %cst_43 = arith.constant dense<0.000000e+00> : vector<16xf32>
    %106 = vector.multi_reduction <add>, %105, %cst_43 [1] : vector<16x32xf32> to vector<16xf32>
    %107 = vector.shape_cast %106 : vector<16xf32> to vector<16x1xf32>
    %cst_44 = arith.constant 3.200000e+01 : f32
    %108 = vector.broadcast %cst_44 : f32 to vector<16x1xf32>
    %109 = arith.divf %107, %108 : vector<16x1xf32>
    %110 = vector.broadcast %109 : vector<16x1xf32> to vector<16x32xf32>
    %111 = arith.subf %105, %110 : vector<16x32xf32>
    %112 = arith.mulf %111, %111 : vector<16x32xf32>
    %cst_45 = arith.constant dense<0.000000e+00> : vector<16xf32>
    %113 = vector.multi_reduction <add>, %112, %cst_45 [1] : vector<16x32xf32> to vector<16xf32>
    %114 = vector.shape_cast %113 : vector<16xf32> to vector<16x1xf32>
    %cst_46 = arith.constant 3.200000e+01 : f32
    %115 = vector.broadcast %cst_46 : f32 to vector<16x1xf32>
    %116 = arith.divf %114, %115 : vector<16x1xf32>
    %117 = vector.broadcast %109 : vector<16x1xf32> to vector<16x32xf32>
    %118 = arith.subf %105, %117 : vector<16x32xf32>
    %cst_47 = arith.constant 9.99999974E-6 : f32
    %119 = vector.broadcast %cst_47 : f32 to vector<16x1xf32>
    %120 = arith.addf %116, %119 : vector<16x1xf32>
    %121 = math.rsqrt %120 : vector<16x1xf32>
    %122 = vector.broadcast %121 : vector<16x1xf32> to vector<16x32xf32>
    %123 = arith.mulf %118, %122 : vector<16x32xf32>
    %124 = vector.extract_strided_slice %4 {offsets = [2, 0], sizes = [1, 32], strides = [1, 1]} : vector<16x32xf32> to vector<1x32xf32>
    %125 = vector.broadcast %124 : vector<1x32xf32> to vector<16x32xf32>
    %126 = arith.mulf %123, %125 : vector<16x32xf32>
    %127 = vector.extract_strided_slice %4 {offsets = [3, 0], sizes = [1, 32], strides = [1, 1]} : vector<16x32xf32> to vector<1x32xf32>
    %128 = vector.broadcast %127 : vector<1x32xf32> to vector<16x32xf32>
    %129 = arith.addf %126, %128 : vector<16x32xf32>
    %130 = arith.truncf %129 : vector<16x32xf32> to vector<16x32xbf16>
    %c0_48 = arith.constant 0 : index
    %c0_49 = arith.constant 0 : index
    %131 = vector.load %arg10[%c0_48, %c0_49] : memref<32x128xbf16, #tpu.memory_space<vmem>>, vector<32x128xbf16>
    %cst_50 = arith.constant dense<0.000000e+00> : vector<16x128xf32>
    %132 = tpu.matmul %130, %131, %cst_50 {dimension_numbers = #tpu.dot_dimension_numbers<[1], [0], [0], [1], [0, 0, 1, 1], [], []>} : vector<16x32xbf16>, vector<32x128xbf16>, vector<16x128xf32> -> vector<16x128xf32>
    %c0_51 = arith.constant 0 : index
    %c0_52 = arith.constant 0 : index
    %133 = vector.load %arg11[%c0_51, %c0_52] : memref<1x128xf32, #tpu.memory_space<vmem>>, vector<1x128xf32>
    %134 = vector.broadcast %133 : vector<1x128xf32> to vector<16x128xf32>
    %135 = arith.addf %132, %134 : vector<16x128xf32>
    %136 = arith.mulf %135, %135 : vector<16x128xf32>
    %137 = arith.mulf %135, %136 : vector<16x128xf32>
    %cst_53 = arith.constant 4.471500e-02 : f32
    %138 = vector.broadcast %cst_53 : f32 to vector<16x128xf32>
    %139 = arith.mulf %138, %137 : vector<16x128xf32>
    %140 = arith.addf %135, %139 : vector<16x128xf32>
    %cst_54 = arith.constant 0.797884583 : f32
    %141 = vector.broadcast %cst_54 : f32 to vector<16x128xf32>
    %142 = arith.mulf %141, %140 : vector<16x128xf32>
    %143 = math.tanh %142 : vector<16x128xf32>
    %cst_55 = arith.constant 1.000000e+00 : f32
    %144 = vector.broadcast %cst_55 : f32 to vector<16x128xf32>
    %145 = arith.addf %144, %143 : vector<16x128xf32>
    %cst_56 = arith.constant 5.000000e-01 : f32
    %146 = vector.broadcast %cst_56 : f32 to vector<16x128xf32>
    %147 = arith.mulf %146, %145 : vector<16x128xf32>
    %148 = arith.mulf %135, %147 : vector<16x128xf32>
    %149 = arith.truncf %148 : vector<16x128xf32> to vector<16x128xbf16>
    %c0_57 = arith.constant 0 : index
    %c0_58 = arith.constant 0 : index
    %150 = vector.load %arg12[%c0_57, %c0_58] : memref<128x32xbf16, #tpu.memory_space<vmem>>, vector<128x32xbf16>
    %cst_59 = arith.constant dense<0.000000e+00> : vector<16x32xf32>
    %151 = tpu.matmul %149, %150, %cst_59 {dimension_numbers = #tpu.dot_dimension_numbers<[1], [0], [0], [1], [0, 0, 1, 1], [], []>} : vector<16x128xbf16>, vector<128x32xbf16>, vector<16x32xf32> -> vector<16x32xf32>
    %152 = vector.extract_strided_slice %4 {offsets = [7, 0], sizes = [1, 32], strides = [1, 1]} : vector<16x32xf32> to vector<1x32xf32>
    %153 = vector.broadcast %152 : vector<1x32xf32> to vector<16x32xf32>
    %154 = arith.addf %151, %153 : vector<16x32xf32>
    %cst_60 = arith.constant 1.41421354 : f32
    %155 = vector.broadcast %cst_60 : f32 to vector<16x32xf32>
    %156 = arith.mulf %129, %155 : vector<16x32xf32>
    %157 = arith.addf %156, %154 : vector<16x32xf32>
    %cst_61 = arith.constant dense<0.000000e+00> : vector<16xf32>
    %158 = vector.multi_reduction <add>, %157, %cst_61 [1] : vector<16x32xf32> to vector<16xf32>
    %159 = vector.shape_cast %158 : vector<16xf32> to vector<16x1xf32>
    %cst_62 = arith.constant 3.200000e+01 : f32
    %160 = vector.broadcast %cst_62 : f32 to vector<16x1xf32>
    %161 = arith.divf %159, %160 : vector<16x1xf32>
    %162 = vector.broadcast %161 : vector<16x1xf32> to vector<16x32xf32>
    %163 = arith.subf %157, %162 : vector<16x32xf32>
    %164 = arith.mulf %163, %163 : vector<16x32xf32>
    %cst_63 = arith.constant dense<0.000000e+00> : vector<16xf32>
    %165 = vector.multi_reduction <add>, %164, %cst_63 [1] : vector<16x32xf32> to vector<16xf32>
    %166 = vector.shape_cast %165 : vector<16xf32> to vector<16x1xf32>
    %cst_64 = arith.constant 3.200000e+01 : f32
    %167 = vector.broadcast %cst_64 : f32 to vector<16x1xf32>
    %168 = arith.divf %166, %167 : vector<16x1xf32>
    %169 = vector.broadcast %161 : vector<16x1xf32> to vector<16x32xf32>
    %170 = arith.subf %157, %169 : vector<16x32xf32>
    %cst_65 = arith.constant 9.99999974E-6 : f32
    %171 = vector.broadcast %cst_65 : f32 to vector<16x1xf32>
    %172 = arith.addf %168, %171 : vector<16x1xf32>
    %173 = math.rsqrt %172 : vector<16x1xf32>
    %174 = vector.broadcast %173 : vector<16x1xf32> to vector<16x32xf32>
    %175 = arith.mulf %170, %174 : vector<16x32xf32>
    %176 = vector.extract_strided_slice %4 {offsets = [4, 0], sizes = [1, 32], strides = [1, 1]} : vector<16x32xf32> to vector<1x32xf32>
    %177 = vector.broadcast %176 : vector<1x32xf32> to vector<16x32xf32>
    %178 = arith.mulf %175, %177 : vector<16x32xf32>
    %179 = vector.extract_strided_slice %4 {offsets = [5, 0], sizes = [1, 32], strides = [1, 1]} : vector<16x32xf32> to vector<1x32xf32>
    %180 = vector.broadcast %179 : vector<1x32xf32> to vector<16x32xf32>
    %181 = arith.addf %178, %180 : vector<16x32xf32>
    %182 = arith.truncf %181 : vector<16x32xf32> to vector<16x32xbf16>
    %c0_66 = arith.constant 0 : index
    %c0_67 = arith.constant 0 : index
    %183 = vector.load %arg13[%c0_66, %c0_67] : memref<32x128xbf16, #tpu.memory_space<vmem>>, vector<32x128xbf16>
    %cst_68 = arith.constant dense<0.000000e+00> : vector<16x128xf32>
    %184 = tpu.matmul %182, %183, %cst_68 {dimension_numbers = #tpu.dot_dimension_numbers<[1], [0], [0], [1], [0, 0, 1, 1], [], []>} : vector<16x32xbf16>, vector<32x128xbf16>, vector<16x128xf32> -> vector<16x128xf32>
    %c0_69 = arith.constant 0 : index
    %c0_70 = arith.constant 0 : index
    %185 = vector.load %arg14[%c0_69, %c0_70] : memref<16x128xf32, #tpu.memory_space<vmem>>, vector<16x128xf32>
    tpu.vector_store %arg14[%c0_69, %c0_70], %184 {strides = array<i32>} : memref<16x128xf32, #tpu.memory_space<vmem>>, vector<16x128xf32>,
    return
  }
  func.func @transform_0(%arg0: i32) -> (i32, i32) {
    %c0_i32 = arith.constant 0 : i32
    %c0_i32_0 = arith.constant 0 : i32
    %c0_i32_1 = arith.constant 0 : i32
    return %c0_i32, %c0_i32_0 : i32, i32
  }
  func.func @transform_1(%arg0: i32) -> (i32, i32) {
    %c0_i32 = arith.constant 0 : i32
    %c0_i32_0 = arith.constant 0 : i32
    %c0_i32_1 = arith.constant 0 : i32
    return %c0_i32, %c0_i32_0 : i32, i32
  }
  func.func @transform_2(%arg0: i32) -> (i32, i32) {
    %c0_i32 = arith.constant 0 : i32
    %c0_i32_0 = arith.constant 0 : i32
    %c0_i32_1 = arith.constant 0 : i32
    return %c0_i32, %c0_i32_0 : i32, i32
  }
  func.func @transform_3(%arg0: i32) -> (i32, i32) {
    %c0_i32 = arith.constant 0 : i32
    %c0_i32_0 = arith.constant 0 : i32
    %c0_i32_1 = arith.constant 0 : i32
    return %c0_i32, %c0_i32_0 : i32, i32
  }
  func.func @transform_4(%arg0: i32) -> (i32, i32, i32) {
    %c0_i32 = arith.constant 0 : i32
    %c0_i32_0 = arith.constant 0 : i32
    %c0_i32_1 = arith.constant 0 : i32
    %c0_i32_2 = arith.constant 0 : i32
    return %c0_i32, %c0_i32_0, %c0_i32_1 : i32, i32, i32
  }
  func.func @transform_5(%arg0: i32) -> (i32, i32, i32) {
    %c0_i32 = arith.constant 0 : i32
    %c0_i32_0 = arith.constant 0 : i32
    %c0_i32_1 = arith.constant 0 : i32
    %c0_i32_2 = arith.constant 0 : i32
    return %c0_i32, %c0_i32_0, %c0_i32_1 : i32, i32, i32
  }
  func.func @transform_6(%arg0: i32) -> (i32, i32) {
    %c0_i32 = arith.constant 0 : i32
    %c0_i32_0 = arith.constant 0 : i32
    %c0_i32_1 = arith.constant 0 : i32
    return %c0_i32, %c0_i32_0 : i32, i32
  }
  func.func @transform_7(%arg0: i32) -> (i32, i32, i32) {
    %c0_i32 = arith.constant 0 : i32
    %c0_i32_0 = arith.constant 0 : i32
    %c0_i32_1 = arith.constant 0 : i32
    %c0_i32_2 = arith.constant 0 : i32
    return %c0_i32, %c0_i32_0, %c0_i32_1 : i32, i32, i32
  }
  func.func @transform_8(%arg0: i32) -> (i32, i32) {
    %c0_i32 = arith.constant 0 : i32
    %c0_i32_0 = arith.constant 0 : i32
    %c0_i32_1 = arith.constant 0 : i32
    return %c0_i32, %c0_i32_0 : i32, i32
  }
  func.func @transform_9(%arg0: i32) -> (i32, i32) {
    %c0_i32 = arith.constant 0 : i32
    %c0_i32_0 = arith.constant 0 : i32
    %c0_i32_1 = arith.constant 0 : i32
    return %c0_i32, %c0_i32_0 : i32, i32
  }
  func.func @transform_10(%arg0: i32) -> (i32, i32) {
    %c0_i32 = arith.constant 0 : i32
    %c0_i32_0 = arith.constant 0 : i32
    %c0_i32_1 = arith.constant 0 : i32
    return %c0_i32, %c0_i32_0 : i32, i32
  }
  func.func @transform_11(%arg0: i32) -> (i32, i32) {
    %c0_i32 = arith.constant 0 : i32
    %c0_i32_0 = arith.constant 0 : i32
    %c0_i32_1 = arith.constant 0 : i32
    return %c0_i32, %c0_i32_0 : i32, i32
  }
  func.func @transform_12(%arg0: i32) -> (i32, i32) {
    %c0_i32 = arith.constant 0 : i32
    %c0_i32_0 = arith.constant 0 : i32
    %c0_i32_1 = arith.constant 0 : i32
    return %c0_i32, %c0_i32_0 : i32, i32
  }
  func.func @transform_13(%arg0: i32) -> (i32, i32) {
    %c0_i32 = arith.constant 0 : i32
    %c0_i32_0 = arith.constant 0 : i32
    %c0_i32_1 = arith.constant 0 : i32
    return %c0_i32, %c0_i32_0 : i32, i32
  }
}

</mosaic_0001>

<bundles_post_ra>
// kernel: tile.13
= control target key start
LH: loop header
LB: loop body
LE: loop exit
PB: predicated region body
PF: predicated region fallthrough
CT: control target
= control target key end

     0   :  { %s154_s0 = inlined_call_operand.vmem [shape: f32[8,8], index: 0, kind: input, shape index: {}]   ;;  %s155_s1 = inlined_call_operand.vmem [shape: f32[2,8,4,8], index: 1, kind: output, shape index: {}]  }
   0x1   :  { %v4_v0 = vld [vmem:[%s154_s0] ss:$0 sm:$0xff]  ;;  %v51_v1 = vld [vmem:[%s154_s0 + $0x1] ss:$0 sm:$0xff]  ;;  %v54_v2 = vld [vmem:[%s154_s0 + $0x2] ss:$0 sm:$0xff] }
   0x2   :  { %5 = vst [vmem:[%s155_s1] sm:$0xf] %v4_v0  ;;  %50 = vst [vmem:[%s155_s1 + $0x20] sm:$0xf] %v4_v0  ;;  %v57_v3 = vld [vmem:[%s154_s0 + $0x3] ss:$0 sm:$0xff] }
   0x3   :  { %52 = vst [vmem:[%s155_s1 + $0x4] sm:$0xf] %v51_v1  ;;  %53 = vst [vmem:[%s155_s1 + $0x24] sm:$0xf] %v51_v1  ;;  %v60_v4 = vld [vmem:[%s154_s0 + $0x4] ss:$0 sm:$0xff] }
   0x4   :  { %55 = vst [vmem:[%s155_s1 + $0x8] sm:$0xf] %v54_v2  ;;  %56 = vst [vmem:[%s155_s1 + $0x28] sm:$0xf] %v54_v2  ;;  %v63_v5 = vld [vmem:[%s154_s0 + $0x5] ss:$0 sm:$0xff] }
   0x5   :  { %58 = vst [vmem:[%s155_s1 + $0xc] sm:$0xf] %v57_v3  ;;  %59 = vst [vmem:[%s155_s1 + $0x2c] sm:$0xf] %v57_v3  ;;  %v66_v6 = vld [vmem:[%s154_s0 + $0x6] ss:$0 sm:$0xff] }
   0x6   :  { %61 = vst [vmem:[%s155_s1 + $0x10] sm:$0xf] %v60_v4  ;;  %62 = vst [vmem:[%s155_s1 + $0x30] sm:$0xf] %v60_v4  ;;  %v69_v7 = vld [vmem:[%s154_s0 + $0x7] ss:$0 sm:$0xff] }
   0x7   :  { %64 = vst [vmem:[%s155_s1 + $0x14] sm:$0xf] %v63_v5  ;;  %65 = vst [vmem:[%s155_s1 + $0x34] sm:$0xf] %v63_v5 }
   0x8   :  { %67 = vst [vmem:[%s155_s1 + $0x18] sm:$0xf] %v66_v6  ;;  %68 = vst [vmem:[%s155_s1 + $0x38] sm:$0xf] %v66_v6 }
   0x9   :  { %70 = vst [vmem:[%s155_s1 + $0x1c] sm:$0xf] %v69_v7  ;;  %71 = vst [vmem:[%s155_s1 + $0x3c] sm:$0xf] %v69_v7 }

// kernel: tile.14
= control target key start
LH: loop header
LB: loop body
LE: loop exit
PB: predicated region body
PF: predicated region fallthrough
CT: control target
= control target key end

     0   :  { %vm83_vm0 = vcmask 1047556   ;;  %vm85_vm1 = vcmask 64512   ;;  %s196_s9 = smov 24   ;;  %s197_s14 = smov 8   ;;  %vm104_vm2 = vcmask 261312   ;;  %vm125_vm3 = vcmask 195712   ;;  %s290_s0 = inlined_call_operand.vmem [shape: f32[2,8,4,8], index: 0, kind: input, shape index: {}]   ;;  %s291_s1 = inlined_call_operand.vmem [shape: f32[16,32], index: 1, kind: output, shape index: {}]  }
   0x1   :  { %v181_v0 = vld [vmem:[%s290_s0 + $0x1c] sm:$0xf]  ;;  %v182_v1 = vld [vmem:[%s290_s0 + $0x18] sm:$0xf]  ;;  %v183_v2 = vld [vmem:[%s290_s0 + $0x14] sm:$0xf] }
   0x2   :  { %49 = vst [vmem:[#allocation0 + $0x38] sm:$0xf] %v181_v0  ;;  %54 = vst [vmem:[#allocation0 + $0x30] sm:$0xf] %v182_v1  ;;  %v184_v3 = vld [vmem:[%s290_s0 + $0x10] sm:$0xf] }
   0x3   :  { %59 = vst [vmem:[#allocation0 + $0x28] sm:$0xf] %v183_v2  ;;  %v185_v4 = vld [vmem:[%s290_s0 + $0xc] sm:$0xf]  ;;  %v186_v5 = vld [vmem:[%s290_s0 + $0x8] sm:$0xf] }
   0x4   :  { %64 = vst [vmem:[#allocation0 + $0x20] sm:$0xf] %v184_v3  ;;  %69 = vst [vmem:[#allocation0 + $0x18] sm:$0xf] %v185_v4  ;;  %v187_v6 = vld [vmem:[%s290_s0 + $0x4] sm:$0xf] }
   0x5   :  { %74 = vst [vmem:[#allocation0 + $0x10] sm:$0xf] %v186_v5  ;;  %v79_v7 = vld [vmem:[%s290_s0] sm:$0xf]  ;;  %78 = vst [vmem:[#allocation0 + $0x8] sm:$0xf] %v187_v6 }
   0x6   :  { %80 = vst [vmem:[#allocation0] sm:$0xf] %v79_v7  ;;  %v173_v8 = vld [vmem:[%s290_s0 + $0x3c] sm:$0xf]  ;;  %v174_v9 = vld [vmem:[%s290_s0 + $0x38] sm:$0xf] }
   0x7   :  { %9 = vst [vmem:[#allocation0 + $0x78] sm:$0xf] %v173_v8  ;;  %14 = vst [vmem:[#allocation0 + $0x70] sm:$0xf] %v174_v9  ;;  %v175_v10 = vld [vmem:[%s290_s0 + $0x34] sm:$0xf] }
   0x8   :  { %v176_v11 = vld [vmem:[%s290_s0 + $0x30] sm:$0xf]  ;;  %v177_v12 = vld [vmem:[%s290_s0 + $0x2c] sm:$0xf]  ;;  %19 = vst [vmem:[#allocation0 + $0x68] sm:$0xf] %v175_v10 }
   0x9   :  { %24 = vst [vmem:[#allocation0 + $0x60] sm:$0xf] %v176_v11  ;;  %29 = vst [vmem:[#allocation0 + $0x58] sm:$0xf] %v177_v12  ;;  %v178_v13 = vld [vmem:[%s290_s0 + $0x28] sm:$0xf] }
   0xa   :  { %v179_v14 = vld [vmem:[%s290_s0 + $0x24] sm:$0xf]  ;;  %v180_v15 = vld [vmem:[%s290_s0 + $0x20] sm:$0xf]  ;;  %34 = vst [vmem:[#allocation0 + $0x50] sm:$0xf] %v178_v13 }
   0xb   :  { %39 = vst [vmem:[#allocation0 + $0x48] sm:$0xf] %v179_v14  ;;  %44 = vst [vmem:[#allocation0 + $0x40] sm:$0xf] %v180_v15  ;;  %s195_s0 = smov 16   ;;  %vm146_vm4 = vcmask 130112  }
   0xc   :  { %v120_v16 = vld [vmem:[#allocation0 + $0x2] ss:$8 sm:$0xf0]   ;;  %v99_v17 = vld [vmem:[#allocation0 + $0x3] ss:$8 sm:$0xf0]  }
   0xd   :  { %v118_v18 = vld [vmem:[#allocation0 + $0x2] ss:$8 sm:$0xf]   ;;  %v97_v19 = vld [vmem:[#allocation0 + $0x3] ss:$8 sm:$0xf]  }
   0xe   :  { %v122_v20 = vsel %vm83_vm0, %v120_v16, %v118_v18  ;;  %v101_v21 = vsel %vm83_vm0, %v99_v17, %v97_v19  ;;  %v139_v24 = vld [vmem:[#allocation0 + $0x1] ss:$8 sm:$0xf]   ;;  %v81_v32 = vld [vmem:[#allocation0] ss:$8 sm:$0xf]  }
   0xf   :  { %123 = vrot.lane.b32.xlu1 %v122_v20, %s195_s0  ;;  %102 = vrot.lane.b32.xlu0 %v101_v21, %s196_s9  ;;  %v141_v25 = vld [vmem:[#allocation0 + $0x1] ss:$8 sm:$0xf0]   ;;  %v82_v33 = vld [vmem:[#allocation0] ss:$8 sm:$0xf0]  }
  0x10   :  { %v130_v22 = vld [vmem:[#allocation0 + $0x42] ss:$8 sm:$0xf0]   ;;  %v109_v23 = vld [vmem:[#allocation0 + $0x43] ss:$8 sm:$0xf0]   ;;  %v84_v34 = vsel %vm83_vm0, %v82_v33, %v81_v32  ;;  %v143_v38 = vsel %vm83_vm0, %v141_v25, %v139_v24 }
  0x11   :  { %v151_v31 = vld [vmem:[#allocation0 + $0x41] ss:$8 sm:$0xf0]   ;;  %v90_v36 = vld [vmem:[#allocation0 + $0x40] ss:$8 sm:$0xf0]  }
  0x12   :  { %v128_v26 = vld [vmem:[#allocation0 + $0x42] ss:$8 sm:$0xf]   ;;  %v107_v27 = vld [vmem:[#allocation0 + $0x43] ss:$8 sm:$0xf]  }
  0x13   :  { %v132_v28 = vsel %vm83_vm0, %v130_v22, %v128_v26  ;;  %v111_v29 = vsel %vm83_vm0, %v109_v23, %v107_v27  ;;  %v149_v30 = vld [vmem:[#allocation0 + $0x41] ss:$8 sm:$0xf]   ;;  %v88_v35 = vld [vmem:[#allocation0 + $0x40] ss:$8 sm:$0xf]  }
  0x14   :  { %133 = vrot.lane.b32.xlu1 %v132_v28, %s195_s0  ;;  %112 = vrot.lane.b32.xlu0 %v111_v29, %s196_s9  ;;  %v153_v37 = vsel %vm83_vm0, %v151_v31, %v149_v30  ;;  %86 = vst.msk [vmem:[%s291_s1] sm:$0xff] %vm85_vm1, %v84_v34   ;;  %v92_v39 = vsel %vm83_vm0, %v90_v36, %v88_v35 }
  0x15   :  { %188 = vst.msk [vmem:[%s291_s1 + $0x8] sm:$0xff] %vm85_vm1, %v92_v39  }
  0x18   :  { %154 = vrot.lane.b32.xlu1 %v153_v37, %s197_s14  ;;  %144 = vrot.lane.b32.xlu0 %v143_v38, %s197_s14 }
  0x81   :  { %v124_v40 = vpop.permute.xlu1 %123   ;;  %v103_v41 = vpop.permute.xlu0 %102  }
  0x82   :  { %105 = vst.msk [vmem:[%s291_s1] sm:$0xff] %vm104_vm2, %v103_v41  }
  0x83   :  { %126 = vst.msk [vmem:[%s291_s1] sm:$0xff] %vm125_vm3, %v124_v40  }
  0x86   :  { %v134_v42 = vpop.permute.xlu1 %133   ;;  %v113_v43 = vpop.permute.xlu0 %112  }
  0x87   :  { %189 = vst.msk [vmem:[%s291_s1 + $0x8] sm:$0xff] %vm104_vm2, %v113_v43  }
  0x88   :  { %190 = vst.msk [vmem:[%s291_s1 + $0x8] sm:$0xff] %vm125_vm3, %v134_v42  }
  0x8a   :  { %v155_v44 = vpop.permute.xlu1 %154   ;;  %v145_v45 = vpop.permute.xlu0 %144  }
  0x8b   :  { %191 = vst.msk [vmem:[%s291_s1 + $0x8] sm:$0xff] %vm146_vm4, %v155_v44   ;;  %147 = vst.msk [vmem:[%s291_s1] sm:$0xff] %vm146_vm4, %v145_v45  }

// kernel: chat_forward.1
= control target key start
LH: loop header
LB: loop body
LE: loop exit
PB: predicated region body
PF: predicated region fallthrough
CT: control target
= control target key end

     0   :  { %vm55_vm0 = vcmask 261120   ;;  %v2893_v15 = vmov 0.0   ;;  %vm2894_vm1 = vmmov 0   ;;  %v83_v25 = vlaneseq  ;;  %s2895_s24 = smov 112   ;;  %s2896_s25 = smov 120   ;;  %s3602_s0 = inlined_call_operand.vmem [shape: f32[16,32], index: 0, kind: input, shape index: {}]   ;;  %s3603_s7 = inlined_call_operand.vmem [shape: bf16[5,32,32], index: 7, kind: input, shape index: {}]   ;;  %s3604_s6 = inlined_call_operand.vmem [shape: f32[16,32], index: 6, kind: input, shape index: {}]   ;;  %s3605_s2 = inlined_call_operand.vmem [shape: f32[16,32], index: 2, kind: input, shape index: {}]   ;;  %s3606_s1 = inlined_call_operand.vmem [shape: f32[16,32], index: 1, kind: input, shape index: {}]   ;;  %s3607_s4 = inlined_call_operand.vmem [shape: f32[4,16,8], index: 4, kind: input, shape index: {}]   ;;  %s3608_s3 = inlined_call_operand.vmem [shape: f32[16,32], index: 3, kind: input, shape index: {}]   ;;  %s3609_s5 = inlined_call_operand.vmem [shape: f32[4,16,8], index: 5, kind: input, shape index: {}]   ;;  %s3610_s8 = inlined_call_operand.vmem [shape: bf16[32,32], index: 8, kind: input, shape index: {}]   ;;  %s3611_s9 = inlined_call_operand.vmem [shape: bf16[32,128], index: 9, kind: input, shape index: {}]   ;;  %s3612_s11 = inlined_call_operand.vmem [shape: bf16[128,32], index: 11, kind: input, shape index: {}]   ;;  %s3613_s10 = inlined_call_operand.vmem [shape: f32[1,128], index: 10, kind: input, shape index: {}]   ;;  %s3614_s12 = inlined_call_operand.vmem [shape: bf16[32,128], index: 12, kind: input, shape index: {}]   ;;  %s3615_s13 = inlined_call_operand.vmem [shape: f32[16,128], index: 13, kind: output, shape index: {}]  }
   0x1   :  { %v45_v0 = vld [vmem:[%s3602_s0] sm:$0xff]  ;;  %v46_v1 = vld [vmem:[%s3602_s0 + $0x8] sm:$0xff]  ;;  %2647 = vmatprep.subr.bf16.mxu0 %v2893_v15  ;;  %2671 = vmatprep.subr.bf16.mxu1 %v2893_v15  ;;  %v2821_v16 = vld [vmem:[%s3603_s7 + $0x38] sm:$0xff]   ;;  %vm1324_vm2 = vcmask 64512   ;;  %s2901_s22 = smov 8   ;;  %s2902_s23 = smov 24  }
   0x2   :  { %v56_v2 = vsel %vm55_vm0, %v45_v0, 0.0  ;;  %v59_v3 = vsel %vm55_vm0, %v46_v1, 0.0  ;;  %v2820_v14 = vld [vmem:[%s3603_s7 + $0x8] sm:$0xff]   ;;  %v2822_v17 = vld [vmem:[%s3603_s7] sm:$0xff]   ;;  %2651 = vmatprep.mubr.msk.bf16.mxu0 %vm2894_vm1, %v2893_v15  ;;  %2672 = vmatpush3.bf16.msra.mxu1 %v2821_v16  ;;  %v2823_v18 = vld [vmem:[%s3603_s7 + $0x30] sm:$0xff]   ;;  %v3005_v26 = vshrl.u32 %v83_v25, 7 }
   0x3   :  { %57 = vadd.xlane.f32.xlu0 %v56_v2  ;;  %2648 = vmatpush3.bf16.msra.mxu0 %v2820_v14  ;;  %v53_v28 = vld [vmem:[%s3604_s6] sm:$0xff]  ;;  %v2824_v40 = vld [vmem:[%s3603_s7 + $0x18] sm:$0xff]   ;;  %v2825_v42 = vld [vmem:[%s3603_s7 + $0x10] sm:$0xff]   ;;  %vm2099_vm3 = vcmask 130048   ;;  %vm2102_vm4 = vcmask 195584  }
   0x4   :  { %2649 = vmatprep.subr.bf16.mxu0 %v2893_v15  ;;  %2673 = vmatprep.subr.bf16.mxu1 %v2893_v15  ;;  %v85_v27 = vsub.s32 0, %v3005_v26  ;;  %v91_v32 = vsub.s32 1, %v3005_v26  ;;  %v2826_v43 = vld [vmem:[%s3603_s7 + $0x28] sm:$0xff]   ;;  %v2827_v44 = vld [vmem:[%s3603_s7 + $0x20] sm:$0xff]   ;;  %v291_v55 = vsub.s32 3, %v3005_v26  ;;  %v229_v58 = vsub.s32 2, %v3005_v26 }
   0x5   :  { %2675 = vmatprep.mubr.msk.bf16.mxu1 %vm2894_vm1, %v2893_v15  ;;  %v2828_v45 = vld [vmem:[%s3603_s7 + $0x48] sm:$0xff]   ;;  %v2829_v46 = vld [vmem:[%s3603_s7 + $0x40] sm:$0xff]  }
   0x6   :  { %2674 = vmatpush3.bf16.msra.mxu1 %v2823_v18  ;;  %v86_v31 = vrot.slane %v53_v28, %v85_v27  ;;  %v92_v36 = vrot.slane %v53_v28, %v91_v32  ;;  %v3063_v56 = vld [vmem:[%s3604_s6 + $0x8] sm:$0xff] }
   0x7   :  { %60 = vadd.xlane.f32.xlu0 %v59_v3  ;;  %2650 = vmatpush3.bf16.msra.mxu0 %v2822_v17  ;;  %v292_v60 = vrot.slane %v3063_v56, %v291_v55  ;;  %v230_v62 = vrot.slane %v3063_v56, %v229_v58  ;;  %v168_v3 = vrot.slane %v3063_v56, %v91_v32  ;;  %v48_v17 = vld [vmem:[%s3606_s1 + $0x8] sm:$0xff] }
   0x8   :  { %2655 = vmatprep.subr.bf16.mxu0 %v2893_v15  ;;  %2687 = vmatprep.subr.bf16.mxu1 %v2893_v15 }
  0x8c   :  { %v58_v4 = vpop.xlane.xlu0 %57 }
  0x8d   :  { %v63_v5 = vmul.f32 0.03125, %v58_v4 }
  0x8f   :  { %v65_v6 = vsub.f32 %v45_v0, %v63_v5  ;;  %v47_v5 = vld [vmem:[%s3606_s1] sm:$0xff] }
  0x90   :  { %v61_v7 = vpop.xlane.xlu0 %60 }
  0x91   :  { %v64_v8 = vmul.f32 0.03125, %v61_v7  ;;  %v67_v9 = vmul.f32 %v65_v6, %v65_v6  ;;  %v103_v7 = vrot.slane %v3063_v56, %v85_v27 }
  0x93   :  { %v66_v10 = vsub.f32 %v46_v1, %v64_v8  ;;  %v69_v11 = vsel %vm55_vm0, %v67_v9, 0.0  ;;  %v49_v1 = vld [vmem:[%s3605_s2] sm:$0xff] }
  0x94   :  { %70 = vadd.xlane.f32.xlu1 %v69_v11  ;;  %v50_v11 = vld [vmem:[%s3605_s2 + $0x8] sm:$0xff]  ;;  %s2897_s2 = smov 104  }
  0x95   :  { %v68_v12 = vmul.f32 %v66_v10, %v66_v10 }
  0x97   :  { %v72_v13 = vsel %vm55_vm0, %v68_v12, 0.0 }
  0x98   :  { %73 = vadd.xlane.f32.xlu1 %v72_v13 }
 0x11d   :  { %v71_v19 = vpop.xlane.xlu1 %70 }
 0x11e   :  { %v75_v20 = vmul.f32 0.03125, %v71_v19 }
 0x120   :  { %v77_v21 = vadd.f32 1e-05, %v75_v20 }
 0x121   :  { %v74_v22 = vpop.xlane.xlu1 %73 }
 0x122   :  { %2844 = vrsqrt.f32 %v77_v21  ;;  %v76_v23 = vmul.f32 0.03125, %v74_v22 }
 0x124   :  { %v78_v24 = vadd.f32 1e-05, %v76_v23 }
 0x126   :  { %2846 = vrsqrt.f32 %v78_v24 }
 0x12f   :  { %v2845_v29 = vpop.eup %2844 }
 0x130   :  { %v81_v30 = vmul.f32 %v2845_v29, %v65_v6 }
 0x132   :  { %v87_v35 = vmul.f32 %v86_v31, %v81_v30 }
 0x133   :  { %v2847_v33 = vpop.eup %2846 }
 0x134   :  { %v82_v34 = vmul.f32 %v2847_v33, %v66_v10  ;;  %v3014_v38 = vadd.f32 %v92_v36, %v87_v35 }
 0x136   :  { %v88_v37 = vmul.f32 %v86_v31, %v82_v34 }
 0x138   :  { %v3016_v39 = vadd.f32 %v92_v36, %v88_v37  ;;  %v2898_v36 = vmov 1983009808  }
 0x139   :  { %v443_v37 = vunpack.c.l.s4 %v2898_v36 }
 0x13a   :  { %v95_v41 = vpack.c.bf16 %v3016_v39, %v3014_v38 }
 0x13c   :  { %2652 = vmatmul.mubr.msk.bf16.vlgmr.msra.gmra.mxu0 %vm55_vm0, %v95_v41  ;;  %2676 = vmatmul.mubr.msk.bf16.vlgmr.msra.gmra.mxu1 %vm55_vm0, %v95_v41 }
 0x13d   :  { %2656 = vmatpush3.bf16.msra.mxu0 %v2824_v40  ;;  %2659 = vmatprep.mubr.msk.bf16.mxu0 %vm2894_vm1, %v2893_v15  ;;  %v2899_v40 = vmov 1934713408  }
 0x13e   :  { %2657 = vmatprep.subr.bf16.mxu0 %v2893_v15  ;;  %2691 = vmatprep.mubr.msk.bf16.mxu1 %vm2894_vm1, %v2893_v15 }
 0x141   :  { %2658 = vmatpush3.bf16.msra.mxu0 %v2825_v42  ;;  %v444_v42 = vunpack.c.0.s8 %v443_v37 }
 0x142   :  { %2663 = vmatprep.subr.bf16.mxu0 %v2893_v15 }
 0x144   :  { %2660 = vmatmul.mubr.msk.bf16.vlgmr.msra.gmra.mxu0 %vm55_vm0, %v95_v41 }
 0x145   :  { %2664 = vmatpush3.bf16.msra.mxu0 %v2826_v43  ;;  %2667 = vmatprep.mubr.msk.bf16.mxu0 %vm2894_vm1, %v2893_v15 }
 0x146   :  { %2665 = vmatprep.subr.bf16.mxu0 %v2893_v15 }
 0x149   :  { %2666 = vmatpush3.bf16.msra.mxu0 %v2827_v44 }
 0x14a   :  { %2679 = vmatprep.subr.bf16.mxu0 %v2893_v15 }
 0x14c   :  { %2668 = vmatmul.mubr.msk.bf16.vlgmr.msra.gmra.mxu0 %vm55_vm0, %v95_v41 }
 0x14d   :  { %2680 = vmatpush3.bf16.msra.mxu0 %v2828_v45  ;;  %2683 = vmatprep.mubr.msk.bf16.mxu0 %vm2894_vm1, %v2893_v15 }
 0x14e   :  { %2681 = vmatprep.subr.bf16.mxu0 %v2893_v15 }
 0x151   :  { %2682 = vmatpush3.bf16.msra.mxu0 %v2829_v46  ;;  %v3115_v46 = vsub.s32 %v444_v42, %v3005_v26 }
 0x152   :  { %2695 = vmatprep.subr.bf16.mxu0 %v2893_v15 }
 0x154   :  { %2684 = vmatmul.mubr.msk.bf16.vlgmr.msra.gmra.mxu0 %vm55_vm0, %v95_v41  ;;  %v475_v41 = vunpack.c.l.s4 %v2899_v40 }
 0x155   :  { %2699 = vmatprep.mubr.msk.bf16.mxu0 %vm2894_vm1, %v2893_v15 }
 0x156   :  { %v476_v45 = vunpack.c.0.s8 %v475_v41 }
 0x1fc   :  { %v153_v47 = vpop.f32.mrf.mxu0  ;;  %v339_v48 = vpop.f32.mrf.mxu1 }
 0x1fd   :  { %v340_v0 = vadd.f32 %v339_v48, %v292_v60  ;;  %v154_v19 = vadd.f32 %v153_v47, %v103_v7 }
 0x1fe   :  { %v2653_v49 = vpop.f32.mrf.mxu0  ;;  %v2677_v50 = vpop.f32.mrf.mxu1 }
 0x1ff   :  { %v416_v8 = vmul.f32 %v340_v0, %v49_v1  ;;  %v408_v27 = vmul.f32 %v154_v19, %v47_v5 }
 0x200   :  { %v156_v51 = vpop.f32.mrf.mxu0  ;;  %v342_v52 = vpop.f32.mrf.mxu1 }
 0x201   :  { %v343_v9 = vadd.f32 %v342_v52, %v292_v60  ;;  %v157_v32 = vadd.f32 %v156_v51, %v103_v7 }
 0x202   :  { %v2654_v53 = vpop.f32.mrf.mxu0  ;;  %v2678_v54 = vpop.f32.mrf.mxu1 }
 0x203   :  { %v417_v20 = vmul.f32 %v343_v9, %v50_v11  ;;  %v409_v34 = vmul.f32 %v157_v32, %v48_v17  ;;  %v3118_v53 = vsub.s32 %v476_v45, %v3005_v26 }
 0x204   :  { %v215_v57 = vpop.f32.mrf.mxu0 }
 0x205   :  { %v216_v13 = vadd.f32 %v215_v57, %v168_v3 }
 0x206   :  { %v2661_v59 = vpop.f32.mrf.mxu0 }
 0x207   :  { %v410_v23 = vmul.f32 %v216_v13, %v49_v1 }
 0x208   :  { %v218_v61 = vpop.f32.mrf.mxu0 }
 0x209   :  { %v3096_v29 = vadd.f32 %v410_v23, %v408_v27  ;;  %v219_v30 = vadd.f32 %v218_v61, %v168_v3 }
 0x20a   :  { %v2662_v63 = vpop.f32.mrf.mxu0 }
 0x20b   :  { %v411_v33 = vmul.f32 %v219_v30, %v50_v11 }
 0x20c   :  { %v277_v2 = vpop.f32.mrf.mxu0 }
 0x20d   :  { %v278_v4 = vadd.f32 %v277_v2, %v230_v62  ;;  %v3104_v35 = vadd.f32 %v411_v33, %v409_v34 }
 0x20e   :  { %v2669_v6 = vpop.f32.mrf.mxu0 }
 0x20f   :  { %v414_v10 = vmul.f32 %v278_v4, %v47_v5 }
 0x210   :  { %v280_v12 = vpop.f32.mrf.mxu0 }
 0x211   :  { %v418_v14 = vadd.f32 %v416_v8, %v414_v10  ;;  %v281_v16 = vadd.f32 %v280_v12, %v230_v62 }
 0x212   :  { %v2670_v18 = vpop.f32.mrf.mxu0 }
 0x213   :  { %v415_v21 = vmul.f32 %v281_v16, %v48_v17  ;;  %720 = vrot.lane.b32.xlu1 %v418_v14, %s2895_s24  ;;  %714 = vrot.lane.b32.xlu0 %v418_v14, %s2896_s25 }
 0x214   :  { %v3090_v22 = vpop.f32.mrf.mxu0 }
 0x215   :  { %v419_v24 = vadd.f32 %v417_v20, %v415_v21 }
 0x216   :  { %v2685_v25 = vpop.f32.mrf.mxu0 }
 0x217   :  { %726 = vrot.lane.b32.xlu0 %v418_v14, %s2897_s2  ;;  %716 = vrot.lane.b32.xlu1 %v419_v24, %s2896_s25 }
 0x218   :  { %v3094_v28 = vpop.f32.mrf.mxu0 }
 0x21a   :  { %v2686_v31 = vpop.f32.mrf.mxu0 }
 0x21b   :  { %422 = vrot.lane.b32.xlu0 %v3096_v29, %s2896_s25  ;;  %722 = vrot.lane.b32.xlu1 %v419_v24, %s2895_s24 }
 0x21f   :  { %428 = vrot.lane.b32.xlu0 %v3096_v29, %s2895_s24  ;;  %728 = vrot.lane.b32.xlu1 %v419_v24, %s2897_s2 }
 0x223   :  { %434 = vrot.lane.b32.xlu0 %v3096_v29, %s2897_s2  ;;  %424 = vrot.lane.b32.xlu1 %v3104_v35, %s2896_s25 }
 0x227   :  { %430 = vrot.lane.b32.xlu1 %v3104_v35, %s2895_s24 }
 0x22b   :  { %436 = vrot.lane.b32.xlu1 %v3104_v35, %s2897_s2 }
 0x285   :  { %v721_v43 = vpop.permute.xlu1 %720  ;;  %v715_v44 = vpop.permute.xlu0 %714 }
 0x286   :  { %v732_v47 = vcombine.low %v418_v14, %v721_v43  ;;  %v733_v48 = vcombine.high %v418_v14, %v721_v43 }
 0x288   :  { %v740_v54 = vrot.slane %v732_v47, %v3115_v46  ;;  %v747_v57 = vrot.slane %v733_v48, %v3115_v46 }
 0x289   :  { %v727_v49 = vpop.permute.xlu0 %726  ;;  %v717_v50 = vpop.permute.xlu1 %716 }
 0x28a   :  { %v748_v51 = vcombine.low %v715_v44, %v727_v49  ;;  %v749_v52 = vcombine.high %v715_v44, %v727_v49 }
 0x28c   :  { %v756_v59 = vrot.slane %v748_v51, %v3115_v46  ;;  %v763_v60 = vrot.slane %v749_v52, %v3115_v46 }
 0x28d   :  { %v423_v61 = vpop.permute.xlu0 %422  ;;  %v723_v62 = vpop.permute.xlu1 %722 }
 0x28e   :  { %v764_v63 = vcombine.low %v740_v54, %v756_v59  ;;  %v765_v0 = vcombine.high %v740_v54, %v756_v59  ;;  %v780_v1 = vcombine.low %v747_v57, %v763_v60  ;;  %v781_v2 = vcombine.high %v747_v57, %v763_v60 }
 0x28f   :  { %v800_v5 = vcombine.low %v419_v24, %v723_v62  ;;  %v801_v6 = vcombine.high %v419_v24, %v723_v62 }
 0x290   :  { %v772_v3 = vrot.slane %v764_v63, %v3118_v53  ;;  %v779_v4 = vrot.slane %v765_v0, %v3118_v53  ;;  %v788_v7 = vrot.slane %v780_v1, %v3118_v53  ;;  %v795_v8 = vrot.slane %v781_v2, %v3118_v53 }
 0x291   :  { %v429_v9 = vpop.permute.xlu0 %428  ;;  %v729_v10 = vpop.permute.xlu1 %728  ;;  %v808_v16 = vrot.slane %v800_v5, %v3115_v46  ;;  %v815_v17 = vrot.slane %v801_v6, %v3115_v46 }
 0x292   :  { %v816_v11 = vcombine.low %v717_v50, %v729_v10  ;;  %v817_v12 = vcombine.high %v717_v50, %v729_v10  ;;  %v868_v13 = vcombine.low %v772_v3, %v779_v4  ;;  %v2552_v14 = vcombine.high %v772_v3, %v779_v4 }
 0x293   :  { %v884_v18 = vcombine.low %v788_v7, %v795_v8  ;;  %v2553_v19 = vcombine.high %v788_v7, %v795_v8  ;;  %v440_v32 = vcombine.low %v3096_v29, %v429_v9  ;;  %v441_v33 = vcombine.high %v3096_v29, %v429_v9 }
 0x294   :  { %v824_v20 = vrot.slane %v816_v11, %v3115_v46  ;;  %v831_v21 = vrot.slane %v817_v12, %v3115_v46  ;;  %v3135_v37 = vrot.slane %v868_v13, %v3115_v46  ;;  %v3138_v40 = vrot.slane %v2552_v14, %v3115_v46 }
 0x295   :  { %v435_v23 = vpop.permute.xlu0 %434  ;;  %v425_v24 = vpop.permute.xlu1 %424  ;;  %v3141_v41 = vrot.slane %v884_v18, %v3115_v46  ;;  %v3144_v42 = vrot.slane %v2553_v19, %v3115_v46  ;;  %v448_v50 = vrot.slane %v440_v32, %v3115_v46  ;;  %v455_v51 = vrot.slane %v441_v33, %v3115_v46 }
 0x296   :  { %v832_v25 = vcombine.low %v808_v16, %v824_v20  ;;  %v833_v27 = vcombine.high %v808_v16, %v824_v20  ;;  %v848_v30 = vcombine.low %v815_v17, %v831_v21  ;;  %v849_v31 = vcombine.high %v815_v17, %v831_v21 }
 0x297   :  { %v456_v34 = vcombine.low %v423_v61, %v435_v23  ;;  %v457_v36 = vcombine.high %v423_v61, %v435_v23  ;;  %v900_v54 = vcombine.low %v3135_v37, %v3138_v40  ;;  %v916_v57 = vcombine.low %v3141_v41, %v3144_v42 }
 0x298   :  { %v840_v44 = vrot.slane %v832_v25, %v3118_v53  ;;  %v847_v45 = vrot.slane %v833_v27, %v3118_v53  ;;  %v856_v29 = vrot.slane %v848_v30, %v3118_v53  ;;  %v863_v47 = vrot.slane %v849_v31, %v3118_v53 }
 0x299   :  { %v431_v43 = vpop.permute.xlu1 %430  ;;  %v464_v48 = vrot.slane %v456_v34, %v3115_v46  ;;  %v471_v49 = vrot.slane %v457_v36, %v3115_v46  ;;  %v908_v31 = vrot.slane %v900_v54, %v3118_v53  ;;  %v924_v32 = vrot.slane %v916_v57, %v3118_v53 }
 0x29a   :  { %v936_v59 = vcombine.low %v840_v44, %v847_v45  ;;  %v2554_v60 = vcombine.high %v840_v44, %v847_v45  ;;  %v952_v61 = vcombine.low %v856_v29, %v863_v47  ;;  %v2555_v62 = vcombine.high %v856_v29, %v863_v47 }
 0x29b   :  { %v508_v63 = vcombine.low %v3104_v35, %v431_v43  ;;  %v509_v0 = vcombine.high %v3104_v35, %v431_v43  ;;  %v472_v3 = vcombine.low %v448_v50, %v464_v48  ;;  %v473_v4 = vcombine.high %v448_v50, %v464_v48 }
 0x29c   :  { %v488_v5 = vcombine.low %v455_v51, %v471_v49  ;;  %v489_v6 = vcombine.high %v455_v51, %v471_v49  ;;  %v3165_v11 = vrot.slane %v936_v59, %v3115_v46  ;;  %v3168_v12 = vrot.slane %v2554_v60, %v3115_v46  ;;  %v1296_v60 = vld [vmem:[%s3607_s4] sm:$0xff] }
 0x29d   :  { %v437_v52 = vpop.permute.xlu1 %436  ;;  %v516_v7 = vrot.slane %v508_v63, %v3115_v46  ;;  %v523_v8 = vrot.slane %v509_v0, %v3115_v46  ;;  %v3171_v35 = vrot.slane %v952_v61, %v3115_v46  ;;  %v3174_v13 = vrot.slane %v2555_v62, %v3115_v46  ;;  %v1297_v61 = vld [vmem:[%s3607_s4 + $0x8] sm:$0xff] }
 0x29e   :  { %v524_v1 = vcombine.low %v425_v24, %v437_v52  ;;  %v525_v2 = vcombine.high %v425_v24, %v437_v52  ;;  %v480_v19 = vrot.slane %v472_v3, %v3118_v53  ;;  %v487_v20 = vrot.slane %v473_v4, %v3118_v53 }
 0x29f   :  { %v496_v21 = vrot.slane %v488_v5, %v3118_v53  ;;  %v503_v23 = vrot.slane %v489_v6, %v3118_v53  ;;  %v968_v33 = vcombine.low %v3165_v11, %v3168_v12  ;;  %v984_v34 = vcombine.low %v3171_v35, %v3174_v13 }
 0x2a0   :  { %v532_v9 = vrot.slane %v524_v1, %v3115_v46  ;;  %v539_v10 = vrot.slane %v525_v2, %v3115_v46  ;;  %v576_v48 = vcombine.low %v480_v19, %v487_v20  ;;  %v2548_v49 = vcombine.high %v480_v19, %v487_v20 }
 0x2a1   :  { %v976_v29 = vrot.slane %v968_v33, %v3118_v53  ;;  %v992_v47 = vrot.slane %v984_v34, %v3118_v53  ;;  %v592_v50 = vcombine.low %v496_v21, %v503_v23  ;;  %v2549_v51 = vcombine.high %v496_v21, %v503_v23 }
 0x2a2   :  { %v540_v14 = vcombine.low %v516_v7, %v532_v9  ;;  %v541_v16 = vcombine.high %v516_v7, %v532_v9  ;;  %v556_v17 = vcombine.low %v523_v8, %v539_v10  ;;  %v557_v18 = vcombine.high %v523_v8, %v539_v10  ;;  %v1298_v8 = vld [vmem:[%s3607_s4 + $0x10] sm:$0xff]  ;;  %v1299_v9 = vld [vmem:[%s3607_s4 + $0x18] sm:$0xff] }
 0x2a3   :  { %v932_v52 = vcombine.low %v908_v31, %v924_v32  ;;  %v1000_v54 = vcombine.low %v976_v29, %v992_v47  ;;  %v933_v57 = vcombine.high %v908_v31, %v924_v32  ;;  %v1001_v59 = vcombine.high %v976_v29, %v992_v47 }
 0x2a4   :  { %v548_v24 = vrot.slane %v540_v14, %v3118_v53  ;;  %v555_v25 = vrot.slane %v541_v16, %v3118_v53  ;;  %v564_v27 = vrot.slane %v556_v17, %v3118_v53  ;;  %v571_v30 = vrot.slane %v557_v18, %v3118_v53 }
 0x2a5   :  { %v1317_v2 = vpack.c.bf16 %v1000_v54, %v932_v52  ;;  %v1319_v3 = vpack.c.bf16 %v1001_v59, %v933_v57  ;;  %v3211_v4 = vrot.slane %v576_v48, %v3115_v46  ;;  %v3214_v5 = vrot.slane %v2548_v49, %v3115_v46  ;;  %v1301_v52 = vld [vmem:[%s3607_s4 + $0x28] sm:$0xff]  ;;  %v1302_v54 = vld [vmem:[%s3607_s4 + $0x30] sm:$0xff]  ;;  %v1303_v57 = vld [vmem:[%s3607_s4 + $0x38] sm:$0xff] }
 0x2a6   :  { %v644_v36 = vcombine.low %v548_v24, %v555_v25  ;;  %v2550_v43 = vcombine.high %v548_v24, %v555_v25  ;;  %v660_v44 = vcombine.low %v564_v27, %v571_v30  ;;  %v2551_v45 = vcombine.high %v564_v27, %v571_v30 }
 0x2a7   :  { %v3217_v6 = vrot.slane %v592_v50, %v3115_v46  ;;  %v1316_v7 = vpack.c.bf16 %v1297_v61, %v1296_v60  ;;  %v3226_v10 = vrot.slane %v2549_v51, %v3115_v46  ;;  %v1332_v14 = vsel %vm1324_vm2, %v1317_v2, 0  ;;  %v1300_v51 = vld [vmem:[%s3607_s4 + $0x20] sm:$0xff]  ;;  %s2900_s4 = smov 16  }
 0x2a8   :  { %v3199_v62 = vrot.slane %v644_v36, %v3115_v46  ;;  %v3202_v63 = vrot.slane %v2550_v43, %v3115_v46  ;;  %v3205_v0 = vrot.slane %v660_v44, %v3115_v46  ;;  %v3208_v1 = vrot.slane %v2551_v45, %v3115_v46  ;;  %2688 = vmatpush3.bf16.xpose.msra.mxu1 %v1332_v14 }
 0x2a9   :  { %v1382_v16 = vsel %vm1324_vm2, %v1319_v3, 0  ;;  %v969_v17 = vcombine.high %v3165_v11, %v3168_v12  ;;  %v901_v18 = vcombine.high %v3135_v37, %v3138_v40  ;;  %v917_v19 = vcombine.high %v3141_v41, %v3144_v42  ;;  %2689 = vmatprep.subr.bf16.mxu1 %v2893_v15 }
 0x2aa   :  { %2696 = vmatpush3.bf16.xpose.msra.mxu0 %v1382_v16  ;;  %v985_v20 = vcombine.high %v3171_v35, %v3174_v13  ;;  %v676_v21 = vcombine.low %v3199_v62, %v3202_v63  ;;  %v692_v23 = vcombine.low %v3205_v0, %v3208_v1  ;;  %v1318_v11 = vpack.c.bf16 %v1299_v9, %v1298_v8 }
 0x2ab   :  { %2697 = vmatprep.subr.bf16.mxu0 %v2893_v15  ;;  %v608_v37 = vcombine.low %v3211_v4, %v3214_v5  ;;  %v624_v40 = vcombine.low %v3217_v6, %v3226_v10  ;;  %v983_v41 = vrot.slane %v969_v17, %v3118_v53  ;;  %v915_v12 = vrot.slane %v901_v18, %v3118_v53 }
 0x2ac   :  { %v999_v42 = vrot.slane %v985_v20, %v3118_v53  ;;  %v931_v35 = vrot.slane %v917_v19, %v3118_v53  ;;  %v684_v13 = vrot.slane %v676_v21, %v3118_v53  ;;  %v700_v24 = vrot.slane %v692_v23, %v3118_v53  ;;  %v51_v19 = vld [vmem:[%s3608_s3] sm:$0xff] }
 0x2ad   :  { %v1329_v25 = vsel %vm1324_vm2, %v1316_v7, 0  ;;  %v1379_v27 = vsel %vm1324_vm2, %v1318_v11, 0  ;;  %v616_v30 = vrot.slane %v608_v37, %v3118_v53  ;;  %v632_v31 = vrot.slane %v624_v40, %v3118_v53  ;;  %v52_v40 = vld [vmem:[%s3608_s3 + $0x8] sm:$0xff] }
 0x2ae   :  { %v1002_v32 = vcombine.low %v983_v41, %v999_v42  ;;  %v1003_v33 = vcombine.high %v983_v41, %v999_v42  ;;  %v934_v34 = vcombine.low %v915_v12, %v931_v35  ;;  %v708_v36 = vcombine.low %v684_v13, %v700_v24 }
 0x2af   :  { %v709_v43 = vcombine.high %v684_v13, %v700_v24  ;;  %v935_v44 = vcombine.high %v915_v12, %v931_v35  ;;  %v640_v45 = vcombine.low %v616_v30, %v632_v31  ;;  %v641_v29 = vcombine.high %v616_v30, %v632_v31 }
 0x2b0   :  { %2690 = vmatpush3.bf16.xpose.msra.mxu1 %v1329_v25  ;;  %v1321_v47 = vpack.c.bf16 %v1002_v32, %v934_v34  ;;  %v1320_v61 = vpack.c.bf16 %v1301_v52, %v1300_v51  ;;  %v677_v2 = vcombine.high %v3199_v62, %v3202_v63  ;;  %v693_v3 = vcombine.high %v3205_v0, %v3208_v1 }
 0x2b1   :  { %2703 = vmatprep.subr.bf16.mxu1 %v2893_v15  ;;  %v1323_v48 = vpack.c.bf16 %v1003_v33, %v935_v44  ;;  %v1312_v49 = vpack.c.bf16 %v708_v36, %v640_v45  ;;  %v1313_v50 = vpack.c.bf16 %v709_v43, %v641_v29  ;;  %v1322_v7 = vpack.c.bf16 %v1303_v57, %v1302_v54 }
 0x2b2   :  { %2698 = vmatpush3.bf16.xpose.msra.mxu0 %v1379_v27  ;;  %v1432_v59 = vsel %vm1324_vm2, %v1321_v47, 0  ;;  %v609_v8 = vcombine.high %v3211_v4, %v3214_v5  ;;  %v625_v62 = vcombine.high %v3217_v6, %v3226_v10  ;;  %v691_v63 = vrot.slane %v677_v2, %v3118_v53 }
 0x2b3   :  { %2711 = vmatprep.subr.bf16.mxu0 %v2893_v15  ;;  %v1482_v60 = vsel %vm1324_vm2, %v1323_v48, 0  ;;  %v707_v0 = vrot.slane %v693_v3, %v3118_v53  ;;  %v1429_v1 = vsel %vm1324_vm2, %v1320_v61, 0  ;;  %v1479_v9 = vsel %vm1324_vm2, %v1322_v7, 0 }
 0x2b4   :  { %v623_v14 = vrot.slane %v609_v8, %v3118_v53  ;;  %v639_v16 = vrot.slane %v625_v62, %v3118_v53  ;;  %v353_v36 = vsub.s32 4, %v3005_v26 }
 0x2b5   :  { %v710_v17 = vcombine.low %v691_v63, %v707_v0  ;;  %v711_v18 = vcombine.high %v691_v63, %v707_v0 }
 0x2b6   :  { %v642_v4 = vcombine.low %v623_v14, %v639_v16  ;;  %v643_v5 = vcombine.high %v623_v14, %v639_v16 }
 0x2b7   :  { %2692 = vmatmul.mubr.msk.bf16.vlgmr.msra.gmra.mxu1 %vm1324_vm2, %v1312_v49 }
 0x2b8   :  { %2704 = vmatpush3.bf16.xpose.msra.mxu1 %v1432_v59  ;;  %2707 = vmatprep.mubr.msk.bf16.mxu1 %vm2894_vm1, %v2893_v15  ;;  %v1314_v6 = vpack.c.bf16 %v710_v17, %v642_v4  ;;  %v1315_v10 = vpack.c.bf16 %v711_v18, %v643_v5 }
 0x2b9   :  { %2700 = vmatmul.mubr.msk.bf16.vlgmr.msra.gmra.mxu0 %vm1324_vm2, %v1313_v50  ;;  %2705 = vmatprep.subr.bf16.mxu1 %v2893_v15  ;;  %v354_v50 = vrot.slane %v3063_v56, %v353_v36 }
 0x2ba   :  { %2712 = vmatpush3.bf16.xpose.msra.mxu0 %v1482_v60  ;;  %2715 = vmatprep.mubr.msk.bf16.mxu0 %vm2894_vm1, %v2893_v15 }
 0x2bb   :  { %2713 = vmatprep.subr.bf16.mxu0 %v2893_v15  ;;  %v3320_v54 = vadd.f32 %v3094_v28, %v354_v50  ;;  %v3326_v59 = vadd.f32 %v3090_v22, %v354_v50 }
 0x2c0   :  { %2706 = vmatpush3.bf16.xpose.msra.mxu1 %v1429_v1 }
 0x2c1   :  { %2719 = vmatprep.subr.bf16.mxu1 %v2893_v15 }
 0x2c2   :  { %2714 = vmatpush3.bf16.xpose.msra.mxu0 %v1479_v9 }
 0x2c3   :  { %2727 = vmatprep.subr.bf16.mxu0 %v2893_v15 }
 0x2c7   :  { %2708 = vmatmul.mubr.msk.bf16.vlgmr.msra.gmra.mxu1 %vm1324_vm2, %v1314_v6 }
 0x2c8   :  { %2723 = vmatprep.mubr.msk.bf16.mxu1 %vm2894_vm1, %v2893_v15 }
 0x2c9   :  { %2716 = vmatmul.mubr.msk.bf16.vlgmr.msra.gmra.mxu0 %vm1324_vm2, %v1315_v10 }
 0x2ca   :  { %2731 = vmatprep.mubr.msk.bf16.mxu0 %vm2894_vm1, %v2893_v15 }
 0x377   :  { %v1368_v20 = vpop.f32.mrf.mxu1 }
 0x378   :  { %v1369_v23 = vadd.f32 %v1368_v20, %v51_v19 }
 0x379   :  { %v1418_v21 = vpop.f32.mrf.mxu0  ;;  %v2693_v11 = vpop.f32.mrf.mxu1 }
 0x37a   :  { %v1419_v41 = vadd.f32 %v1418_v21, %v51_v19  ;;  %v1525_v42 = vsel %vm55_vm0, %v1369_v23, -inf }
 0x37b   :  { %v2701_v37 = vpop.f32.mrf.mxu0  ;;  %1526 = vmax.xlane.f32.xlu0 %v1525_v42  ;;  %v1371_v12 = vpop.f32.mrf.mxu1 }
 0x37c   :  { %v1372_v13 = vadd.f32 %v1371_v12, %v52_v40  ;;  %v1531_v31 = vsel %vm55_vm0, %v1419_v41, -inf }
 0x37d   :  { %v1421_v35 = vpop.f32.mrf.mxu0  ;;  %v2694_v24 = vpop.f32.mrf.mxu1 }
 0x37e   :  { %v1422_v27 = vadd.f32 %v1421_v35, %v52_v40  ;;  %v1528_v30 = vsel %vm55_vm0, %v1372_v13, -inf }
 0x37f   :  { %v2702_v25 = vpop.f32.mrf.mxu0  ;;  %1529 = vmax.xlane.f32.xlu1 %v1528_v30  ;;  %1532 = vmax.xlane.f32.xlu0 %v1531_v31 }
 0x380   :  { %v1534_v32 = vsel %vm55_vm0, %v1422_v27, -inf }
 0x383   :  { %1535 = vmax.xlane.f32.xlu0 %v1534_v32 }
 0x387   :  { %v1468_v33 = vpop.f32.mrf.mxu1 }
 0x388   :  { %v1469_v43 = vadd.f32 %v1468_v33, %v51_v19 }
 0x389   :  { %v1518_v34 = vpop.f32.mrf.mxu0  ;;  %v2709_v44 = vpop.f32.mrf.mxu1 }
 0x38a   :  { %v1519_v29 = vadd.f32 %v1518_v34, %v51_v19  ;;  %v1537_v47 = vsel %vm55_vm0, %v1469_v43, -inf }
 0x38b   :  { %v2717_v45 = vpop.f32.mrf.mxu0  ;;  %v1471_v48 = vpop.f32.mrf.mxu1  ;;  %1538 = vmax.xlane.f32.xlu0 %v1537_v47 }
 0x38c   :  { %v1543_v57 = vsel %vm55_vm0, %v1519_v29, -inf  ;;  %v1472_v56 = vadd.f32 %v1471_v48, %v52_v40 }
 0x38d   :  { %v1521_v49 = vpop.f32.mrf.mxu0  ;;  %v2710_v51 = vpop.f32.mrf.mxu1 }
 0x38e   :  { %v1522_v28 = vadd.f32 %v1521_v49, %v52_v40  ;;  %v1540_v60 = vsel %vm55_vm0, %v1472_v56, -inf }
 0x38f   :  { %v2718_v52 = vpop.f32.mrf.mxu0  ;;  %1544 = vmax.xlane.f32.xlu0 %v1543_v57 }
 0x390   :  { %1008 = vrot.lane.b32.xlu1 %v3320_v54, %s2896_s25  ;;  %v1546_v61 = vsel %vm55_vm0, %v1522_v28, -inf }
 0x394   :  { %1012 = vrot.lane.b32.xlu1 %v3326_v59, %s2895_s24 }
 0x3a5   :  { %1006 = vrot.lane.b32.xlu0 %v3326_v59, %s2896_s25 }
 0x3a9   :  { %1018 = vrot.lane.b32.xlu0 %v3326_v59, %s2897_s2 }
 0x3b8   :  { %1541 = vmax.xlane.f32.xlu1 %v1540_v60 }
 0x3bc   :  { %1547 = vmax.xlane.f32.xlu1 %v1546_v61 }
 0x3cd   :  { %1014 = vrot.lane.b32.xlu1 %v3320_v54, %s2895_s24 }
 0x404   :  { %v1527_v22 = vpop.xlane.xlu0 %1526 }
 0x405   :  { %v1549_v2 = vsub.f32 %v1369_v23, %v1527_v22 }
 0x407   :  { %v1557_v3 = vmul.f32 1.442695, %v1549_v2 }
 0x408   :  { %v1530_v7 = vpop.xlane.xlu1 %1529  ;;  %v1533_v8 = vpop.xlane.xlu0 %1532 }
 0x409   :  { %2848 = vpow2.f32 %v1557_v3  ;;  %v1550_v62 = vsub.f32 %v1372_v13, %v1530_v7  ;;  %v1551_v63 = vsub.f32 %v1419_v41, %v1533_v8 }
 0x40b   :  { %v1559_v0 = vmul.f32 1.442695, %v1550_v62  ;;  %v1561_v1 = vmul.f32 1.442695, %v1551_v63 }
 0x40c   :  { %v1536_v9 = vpop.xlane.xlu0 %1535  ;;  %v1009_v24 = vpop.permute.xlu1 %1008 }
 0x40d   :  { %2850 = vpow2.f32 %v1559_v0  ;;  %v1552_v14 = vsub.f32 %v1422_v27, %v1536_v9 }
 0x40e   :  { %2852 = vpow2.f32 %v1561_v1 }
 0x40f   :  { %v1563_v16 = vmul.f32 1.442695, %v1552_v14 }
 0x410   :  { %v1013_v25 = vpop.permute.xlu1 %1012 }
 0x411   :  { %2854 = vpow2.f32 %v1563_v16  ;;  %v1024_v50 = vcombine.low %v3326_v59, %v1013_v25  ;;  %v1025_v52 = vcombine.high %v3326_v59, %v1013_v25 }
 0x413   :  { %v1039_v61 = vrot.slane %v1025_v52, %v3115_v46 }
 0x414   :  { %v1539_v17 = vpop.xlane.xlu0 %1538 }
 0x415   :  { %v1553_v18 = vsub.f32 %v1469_v43, %v1539_v17 }
 0x416   :  { %v3338_v4 = vpop.eup %2848 }
 0x417   :  { %v1565_v5 = vmul.f32 1.442695, %v1553_v18  ;;  %v1573_v6 = vsel %vm55_vm0, %v3338_v4, 0.0 }
 0x418   :  { %1574 = vadd.xlane.f32.xlu0 %v1573_v6  ;;  %v1545_v10 = vpop.xlane.xlu0 %1544 }
 0x419   :  { %2856 = vpow2.f32 %v1565_v5  ;;  %v1555_v19 = vsub.f32 %v1519_v29, %v1545_v10 }
 0x41a   :  { %v3342_v20 = vpop.eup %2850 }
 0x41b   :  { %v3344_v21 = vpop.eup %2852  ;;  %v1569_v23 = vmul.f32 1.442695, %v1555_v19  ;;  %v1576_v11 = vsel %vm55_vm0, %v3342_v20, 0.0 }
 0x41c   :  { %v1579_v37 = vsel %vm55_vm0, %v3344_v21, 0.0  ;;  %1577 = vadd.xlane.f32.xlu1 %v1576_v11  ;;  %v1007_v47 = vpop.permute.xlu0 %1006 }
 0x41d   :  { %2858 = vpow2.f32 %v1569_v23  ;;  %1580 = vadd.xlane.f32.xlu0 %v1579_v37 }
 0x41e   :  { %v3350_v40 = vpop.eup %2854 }
 0x41f   :  { %v1582_v41 = vsel %vm55_vm0, %v3350_v40, 0.0 }
 0x420   :  { %1583 = vadd.xlane.f32.xlu1 %v1582_v41  ;;  %v1019_v48 = vpop.permute.xlu0 %1018 }
 0x421   :  { %v1040_v49 = vcombine.low %v1007_v47, %v1019_v48  ;;  %v1041_v51 = vcombine.high %v1007_v47, %v1019_v48 }
 0x423   :  { %v1048_v57 = vrot.slane %v1040_v49, %v3115_v46 }
 0x426   :  { %v3354_v42 = vpop.eup %2856 }
 0x427   :  { %v1585_v12 = vsel %vm55_vm0, %v3354_v42, 0.0 }
 0x428   :  { %1586 = vadd.xlane.f32.xlu0 %v1585_v12 }
 0x42a   :  { %v3358_v35 = vpop.eup %2858 }
 0x42b   :  { %v1591_v13 = vsel %vm55_vm0, %v3358_v35, 0.0 }
 0x42c   :  { %1592 = vadd.xlane.f32.xlu0 %v1591_v13 }
 0x431   :  { %1020 = vrot.lane.b32.xlu1 %v3320_v54, %s2897_s2 }
 0x441   :  { %v1542_v27 = vpop.xlane.xlu1 %1541 }
 0x442   :  { %v1554_v30 = vsub.f32 %v1472_v56, %v1542_v27  ;;  %v1032_v56 = vrot.slane %v1024_v50, %v3115_v46 }
 0x444   :  { %v1567_v31 = vmul.f32 1.442695, %v1554_v30  ;;  %v1056_v22 = vcombine.low %v1032_v56, %v1048_v57  ;;  %v1057_v2 = vcombine.high %v1032_v56, %v1048_v57 }
 0x445   :  { %v1548_v32 = vpop.xlane.xlu1 %1547 }
 0x446   :  { %2860 = vpow2.f32 %v1567_v31  ;;  %v1556_v33 = vsub.f32 %v1522_v28, %v1548_v32  ;;  %v1055_v28 = vrot.slane %v1041_v51, %v3115_v46  ;;  %v1064_v62 = vrot.slane %v1056_v22, %v3118_v53 }
 0x447   :  { %v1071_v63 = vrot.slane %v1057_v2, %v3118_v53 }
 0x448   :  { %v1571_v34 = vmul.f32 1.442695, %v1556_v33  ;;  %v1072_v3 = vcombine.low %v1039_v61, %v1055_v28  ;;  %v1073_v7 = vcombine.high %v1039_v61, %v1055_v28 }
 0x449   :  { %v1015_v60 = vpop.permute.xlu1 %1014  ;;  %v1160_v9 = vcombine.low %v1064_v62, %v1071_v63  ;;  %v2556_v18 = vcombine.high %v1064_v62, %v1071_v63 }
 0x44a   :  { %2862 = vpow2.f32 %v1571_v34  ;;  %v1080_v59 = vrot.slane %v1072_v3, %v3118_v53  ;;  %v1087_v0 = vrot.slane %v1073_v7, %v3118_v53  ;;  %v1092_v14 = vcombine.low %v3320_v54, %v1015_v60 }
 0x44b   :  { %v1093_v16 = vcombine.high %v3320_v54, %v1015_v60  ;;  %v1167_v11 = vrot.slane %v1160_v9, %v3115_v46  ;;  %v1175_v54 = vrot.slane %v2556_v18, %v3115_v46 }
 0x44c   :  { %v1176_v5 = vcombine.low %v1080_v59, %v1087_v0  ;;  %v2557_v6 = vcombine.high %v1080_v59, %v1087_v0  ;;  %v1100_v37 = vrot.slane %v1092_v14, %v3115_v46 }
 0x44d   :  { %v1107_v41 = vrot.slane %v1093_v16, %v3115_v46  ;;  %v1192_v48 = vcombine.low %v1167_v11, %v1175_v54 }
 0x44e   :  { %v1183_v25 = vrot.slane %v1176_v5, %v3115_v46  ;;  %v1191_v27 = vrot.slane %v2557_v6, %v3115_v46  ;;  %v1304_v6 = vld [vmem:[%s3609_s5] sm:$0xff] }
 0x44f   :  { %v1200_v22 = vrot.slane %v1192_v48, %v3118_v53 }
 0x450   :  { %v1208_v49 = vcombine.low %v1183_v25, %v1191_v27  ;;  %v1209_v9 = vcombine.high %v1183_v25, %v1191_v27 }
 0x452   :  { %v1216_v2 = vrot.slane %v1208_v49, %v3118_v53  ;;  %v1308_v49 = vld [vmem:[%s3609_s5 + $0x20] sm:$0xff] }
 0x453   :  { %v3364_v43 = vpop.eup %2860 }
 0x454   :  { %v1588_v44 = vsel %vm55_vm0, %v3364_v43, 0.0  ;;  %v1224_v16 = vcombine.low %v1200_v22, %v1216_v2  ;;  %v1225_v18 = vcombine.high %v1200_v22, %v1216_v2 }
 0x455   :  { %1589 = vadd.xlane.f32.xlu1 %v1588_v44 }
 0x457   :  { %v3368_v45 = vpop.eup %2862 }
 0x458   :  { %v1594_v29 = vsel %vm55_vm0, %v3368_v45, 0.0 }
 0x459   :  { %1595 = vadd.xlane.f32.xlu0 %v1594_v29 }
 0x4a1   :  { %v1575_v17 = vpop.xlane.xlu0 %1574 }
 0x4a2   :  { %2864 = vrcp.f32 %v1575_v17 }
 0x4a5   :  { %v1578_v8 = vpop.xlane.xlu1 %1577 }
 0x4a6   :  { %2866 = vrcp.f32 %v1578_v8  ;;  %v1581_v30 = vpop.xlane.xlu0 %1580 }
 0x4a9   :  { %v1584_v1 = vpop.xlane.xlu1 %1583 }
 0x4aa   :  { %2868 = vrcp.f32 %v1584_v1  ;;  %v1193_v1 = vcombine.high %v1167_v11, %v1175_v54 }
 0x4ab   :  { %2870 = vrcp.f32 %v1581_v30 }
 0x4ac   :  { %v1207_v54 = vrot.slane %v1193_v1, %v3118_v53 }
 0x4ad   :  { %v1021_v10 = vpop.permute.xlu1 %1020 }
 0x4ae   :  { %v1108_v19 = vcombine.low %v1009_v24, %v1021_v10  ;;  %v1109_v23 = vcombine.high %v1009_v24, %v1021_v10  ;;  %v1305_v10 = vld [vmem:[%s3609_s5 + $0x8] sm:$0xff] }
 0x4af   :  { %v2865_v0 = vpop.eup %2864  ;;  %v1617_v27 = vpack.c.bf16 %v1305_v10, %v1304_v6 }
 0x4b0   :  { %v1116_v12 = vrot.slane %v1108_v19, %v3115_v46  ;;  %v1123_v13 = vrot.slane %v1109_v23, %v3115_v46  ;;  %v1306_v19 = vld [vmem:[%s3609_s5 + $0x10] sm:$0xff]  ;;  %v1307_v23 = vld [vmem:[%s3609_s5 + $0x18] sm:$0xff] }
 0x4b1   :  { %v1619_v30 = vpack.c.bf16 %v1307_v23, %v1306_v19 }
 0x4b2   :  { %v1124_v24 = vcombine.low %v1100_v37, %v1116_v12  ;;  %v1125_v31 = vcombine.high %v1100_v37, %v1116_v12  ;;  %v1140_v32 = vcombine.low %v1107_v41, %v1123_v13  ;;  %v1141_v33 = vcombine.high %v1107_v41, %v1123_v13 }
 0x4b3   :  { %v2867_v14 = vpop.eup %2866 }
 0x4b4   :  { %v1132_v34 = vrot.slane %v1124_v24, %v3118_v53  ;;  %v1139_v44 = vrot.slane %v1125_v31, %v3118_v53  ;;  %v1148_v29 = vrot.slane %v1140_v32, %v3118_v53  ;;  %v1155_v47 = vrot.slane %v1141_v33, %v3118_v53 }
 0x4b5   :  { %v1223_v24 = vrot.slane %v1209_v9, %v3118_v53  ;;  %v1606_v31 = vmul.f32 %v2867_v14, %v3342_v20  ;;  %v1310_v20 = vld [vmem:[%s3609_s5 + $0x30] sm:$0xff] }
 0x4b6   :  { %v1228_v50 = vcombine.low %v1132_v34, %v1139_v44  ;;  %v2558_v51 = vcombine.high %v1132_v34, %v1139_v44  ;;  %v1244_v52 = vcombine.low %v1148_v29, %v1155_v47  ;;  %v2559_v57 = vcombine.high %v1148_v29, %v1155_v47 }
 0x4b7   :  { %v2869_v11 = vpop.eup %2868  ;;  %v1605_v44 = vmul.f32 %v2865_v0, %v3338_v4  ;;  %v1226_v47 = vcombine.low %v1207_v54, %v1223_v24  ;;  %v1227_v48 = vcombine.high %v1207_v54, %v1223_v24  ;;  %v1309_v4 = vld [vmem:[%s3609_s5 + $0x28] sm:$0xff] }
 0x4b8   :  { %v1235_v56 = vrot.slane %v1228_v50, %v3115_v46  ;;  %v1243_v28 = vrot.slane %v2558_v51, %v3115_v46  ;;  %v1251_v60 = vrot.slane %v1244_v52, %v3115_v46  ;;  %v1259_v61 = vrot.slane %v2559_v57, %v3115_v46  ;;  %v2871_v25 = vpop.eup %2870 }
 0x4b9   :  { %v1608_v32 = vmul.f32 %v2869_v11, %v3350_v40  ;;  %v1607_v29 = vmul.f32 %v2871_v25, %v3344_v21  ;;  %v1613_v50 = vpack.c.bf16 %v1606_v31, %v1605_v44  ;;  %v1311_v21 = vld [vmem:[%s3609_s5 + $0x38] sm:$0xff]  ;;  %v1621_v57 = vpack.c.bf16 %v1309_v4, %v1308_v49 }
 0x4ba   :  { %v1260_v3 = vcombine.low %v1235_v56, %v1243_v28  ;;  %v1276_v7 = vcombine.low %v1251_v60, %v1259_v61  ;;  %v1261_v63 = vcombine.high %v1235_v56, %v1243_v28  ;;  %v1277_v59 = vcombine.high %v1251_v60, %v1259_v61  ;;  %v1587_v28 = vpop.xlane.xlu0 %1586 }
 0x4bb   :  { %v1614_v51 = vpack.c.bf16 %v1608_v32, %v1607_v29  ;;  %v1623_v56 = vpack.c.bf16 %v1311_v21, %v1310_v20  ;;  %2872 = vrcp.f32 %v1587_v28 }
 0x4bc   :  { %v1268_v8 = vrot.slane %v1260_v3, %v3118_v53  ;;  %v1284_v62 = vrot.slane %v1276_v7, %v3118_v53  ;;  %v1275_v12 = vrot.slane %v1261_v63, %v3118_v53  ;;  %v1291_v13 = vrot.slane %v1277_v59, %v3118_v53 }
 0x4be   :  { %v1292_v17 = vcombine.low %v1268_v8, %v1284_v62  ;;  %v1293_v5 = vcombine.high %v1268_v8, %v1284_v62  ;;  %v1294_v33 = vcombine.low %v1275_v12, %v1291_v13  ;;  %v1295_v34 = vcombine.high %v1275_v12, %v1291_v13  ;;  %v1593_v60 = vpop.xlane.xlu0 %1592 }
 0x4c0   :  { %v1618_v37 = vpack.c.bf16 %v1292_v17, %v1224_v16  ;;  %v1620_v41 = vpack.c.bf16 %v1293_v5, %v1225_v18  ;;  %v1622_v40 = vpack.c.bf16 %v1294_v33, %v1226_v47  ;;  %v1624_v52 = vpack.c.bf16 %v1295_v34, %v1227_v48 }
 0x4c2   :  { %2720 = vmatpush3.bf16.msra.mxu1 %v1618_v37  ;;  %2728 = vmatpush3.bf16.msra.mxu0 %v1620_v41 }
 0x4c3   :  { %2721 = vmatprep.subr.bf16.mxu1 %v2893_v15  ;;  %2729 = vmatprep.subr.bf16.mxu0 %v2893_v15 }
 0x4c6   :  { %2722 = vmatpush3.bf16.msra.mxu1 %v1617_v27  ;;  %2730 = vmatpush3.bf16.msra.mxu0 %v1619_v30 }
 0x4c7   :  { %2735 = vmatprep.subr.bf16.mxu1 %v2893_v15  ;;  %2743 = vmatprep.subr.bf16.mxu0 %v2893_v15 }
 0x4c8   :  { %v2873_v2 = vpop.eup %2872 }
 0x4c9   :  { %2724 = vmatmul.mubr.msk.bf16.vlgmr.msra.gmra.mxu1 %vm55_vm0, %v1613_v50  ;;  %2732 = vmatmul.mubr.msk.bf16.vlgmr.msra.gmra.mxu0 %vm55_vm0, %v1614_v51  ;;  %v1609_v7 = vmul.f32 %v2873_v2, %v3354_v42 }
 0x4ca   :  { %2736 = vmatpush3.bf16.msra.mxu1 %v1622_v40  ;;  %2744 = vmatpush3.bf16.msra.mxu0 %v1624_v52 }
 0x4cb   :  { %2737 = vmatprep.subr.bf16.mxu1 %v2893_v15  ;;  %2739 = vmatprep.mubr.msk.bf16.mxu1 %vm2894_vm1, %v2893_v15 }
 0x4cc   :  { %2745 = vmatprep.subr.bf16.mxu0 %v2893_v15  ;;  %2747 = vmatprep.mubr.msk.bf16.mxu0 %vm2894_vm1, %v2893_v15 }
 0x4ce   :  { %2738 = vmatpush3.bf16.msra.mxu1 %v1621_v57  ;;  %2746 = vmatpush3.bf16.msra.mxu0 %v1623_v56 }
 0x4cf   :  { %2751 = vmatprep.subr.bf16.mxu1 %v2893_v15  ;;  %2759 = vmatprep.subr.bf16.mxu0 %v2893_v15 }
 0x4de   :  { %v1590_v61 = vpop.xlane.xlu1 %1589 }
 0x4df   :  { %2874 = vrcp.f32 %v1590_v61 }
 0x4e0   :  { %2876 = vrcp.f32 %v1593_v60 }
 0x4e2   :  { %v1596_v22 = vpop.xlane.xlu0 %1595 }
 0x4e3   :  { %2878 = vrcp.f32 %v1596_v22 }
 0x4ec   :  { %v2875_v3 = vpop.eup %2874 }
 0x4ed   :  { %v1610_v8 = vmul.f32 %v2875_v3, %v3364_v43  ;;  %v2877_v62 = vpop.eup %2876 }
 0x4ee   :  { %v1611_v0 = vmul.f32 %v2877_v62, %v3358_v35 }
 0x4ef   :  { %v1615_v63 = vpack.c.bf16 %v1610_v8, %v1609_v7 }
 0x4f0   :  { %v2879_v59 = vpop.eup %2878 }
 0x4f1   :  { %2740 = vmatmul.mubr.msk.bf16.vlgmr.msra.gmra.mxu1 %vm55_vm0, %v1615_v63  ;;  %v1612_v1 = vmul.f32 %v2879_v59, %v3368_v45 }
 0x4f2   :  { %2755 = vmatprep.mubr.msk.bf16.mxu1 %vm2894_vm1, %v2893_v15 }
 0x4f3   :  { %v1616_v9 = vpack.c.bf16 %v1612_v1, %v1611_v0 }
 0x4f5   :  { %2748 = vmatmul.mubr.msk.bf16.vlgmr.msra.gmra.mxu0 %vm55_vm0, %v1616_v9 }
 0x4f6   :  { %2763 = vmatprep.mubr.msk.bf16.mxu0 %vm2894_vm1, %v2893_v15 }
 0x589   :  { %v1662_v42 = vpop.f32.mrf.mxu1  ;;  %v1706_v43 = vpop.f32.mrf.mxu0 }
 0x58b   :  { %v2725_v14 = vpop.f32.mrf.mxu1  ;;  %v2733_v16 = vpop.f32.mrf.mxu0 }
 0x58d   :  { %v1665_v17 = vpop.f32.mrf.mxu1  ;;  %v1709_v18 = vpop.f32.mrf.mxu0 }
 0x58f   :  { %v2726_v5 = vpop.f32.mrf.mxu1  ;;  %v2734_v6 = vpop.f32.mrf.mxu0 }
 0x5b1   :  { %v1750_v35 = vpop.f32.mrf.mxu1 }
 0x5b2   :  { %v1801_v45 = vcombine.low %v1662_v42, %v1750_v35  ;;  %v1802_v19 = vcombine.high %v1662_v42, %v1750_v35 }
 0x5b3   :  { %v2741_v10 = vpop.f32.mrf.mxu1 }
 0x5b4   :  { %v1809_v54 = vrot.slane %v1801_v45, %v3115_v46  ;;  %v1816_v25 = vrot.slane %v1802_v19, %v3115_v46 }
 0x5b5   :  { %v1753_v23 = vpop.f32.mrf.mxu1  ;;  %v1794_v11 = vpop.f32.mrf.mxu0 }
 0x5b6   :  { %v1817_v37 = vcombine.low %v1706_v43, %v1794_v11  ;;  %v1818_v41 = vcombine.high %v1706_v43, %v1794_v11  ;;  %v1869_v24 = vcombine.low %v1665_v17, %v1753_v23  ;;  %v1870_v31 = vcombine.high %v1665_v17, %v1753_v23 }
 0x5b7   :  { %v2742_v12 = vpop.f32.mrf.mxu1  ;;  %v2749_v13 = vpop.f32.mrf.mxu0 }
 0x5b8   :  { %v1825_v27 = vrot.slane %v1817_v37, %v3115_v46  ;;  %v1832_v30 = vrot.slane %v1818_v41, %v3115_v46  ;;  %v1877_v21 = vrot.slane %v1869_v24, %v3115_v46  ;;  %v1884_v40 = vrot.slane %v1870_v31, %v3115_v46  ;;  %v2830_v41 = vld [vmem:[%s3610_s8 + $0x8] sm:$0xff]  }
 0x5b9   :  { %v1797_v32 = vpop.f32.mrf.mxu0  ;;  %2752 = vmatpush3.bf16.msra.mxu1 %v2830_v41 }
 0x5ba   :  { %v1833_v33 = vcombine.low %v1809_v54, %v1825_v27  ;;  %v1834_v34 = vcombine.high %v1809_v54, %v1825_v27  ;;  %v1849_v44 = vcombine.low %v1816_v25, %v1832_v30  ;;  %v1850_v29 = vcombine.high %v1816_v25, %v1832_v30  ;;  %2753 = vmatprep.subr.bf16.mxu1 %v2893_v15 }
 0x5bb   :  { %v1885_v47 = vcombine.low %v1709_v18, %v1797_v32  ;;  %v1886_v48 = vcombine.high %v1709_v18, %v1797_v32  ;;  %v2750_v49 = vpop.f32.mrf.mxu0 }
 0x5bc   :  { %v1841_v50 = vrot.slane %v1833_v33, %v3118_v53  ;;  %v1848_v51 = vrot.slane %v1834_v34, %v3118_v53  ;;  %v1857_v4 = vrot.slane %v1849_v44, %v3118_v53  ;;  %v1864_v20 = vrot.slane %v1850_v29, %v3118_v53  ;;  %v2831_v34 = vld [vmem:[%s3610_s8] sm:$0xff]  }
 0x5bd   :  { %v1893_v52 = vrot.slane %v1885_v47, %v3115_v46  ;;  %v1900_v57 = vrot.slane %v1886_v48, %v3115_v46  ;;  %2754 = vmatpush3.bf16.msra.mxu1 %v2831_v34 }
 0x5be   :  { %v1937_v56 = vcombine.low %v1841_v50, %v1848_v51  ;;  %v2568_v28 = vcombine.high %v1841_v50, %v1848_v51  ;;  %v1953_v60 = vcombine.low %v1857_v4, %v1864_v20  ;;  %v2569_v61 = vcombine.high %v1857_v4, %v1864_v20  ;;  %2767 = vmatprep.subr.bf16.mxu1 %v2893_v15 }
 0x5bf   :  { %v1901_v22 = vcombine.low %v1877_v21, %v1893_v52  ;;  %v1902_v2 = vcombine.high %v1877_v21, %v1893_v52  ;;  %v1917_v3 = vcombine.low %v1884_v40, %v1900_v57  ;;  %v1918_v7 = vcombine.high %v1884_v40, %v1900_v57 }
 0x5c0   :  { %v1944_v8 = vrot.slane %v1937_v56, %v3115_v46  ;;  %v1952_v62 = vrot.slane %v2568_v28, %v3115_v46  ;;  %v1960_v63 = vrot.slane %v1953_v60, %v3115_v46  ;;  %v1968_v59 = vrot.slane %v2569_v61, %v3115_v46 }
 0x5c1   :  { %v1909_v0 = vrot.slane %v1901_v22, %v3118_v53  ;;  %v1916_v1 = vrot.slane %v1902_v2, %v3118_v53  ;;  %v1925_v9 = vrot.slane %v1917_v3, %v3118_v53  ;;  %v1932_v42 = vrot.slane %v1918_v7, %v3118_v53 }
 0x5c2   :  { %v1970_v43 = vcombine.high %v1944_v8, %v1952_v62  ;;  %v1986_v14 = vcombine.high %v1960_v63, %v1968_v59  ;;  %v1969_v16 = vcombine.low %v1944_v8, %v1952_v62  ;;  %v1985_v17 = vcombine.low %v1960_v63, %v1968_v59 }
 0x5c3   :  { %v2005_v18 = vcombine.low %v1909_v0, %v1916_v1  ;;  %v2570_v5 = vcombine.high %v1909_v0, %v1916_v1  ;;  %v2021_v6 = vcombine.low %v1925_v9, %v1932_v42  ;;  %v2571_v35 = vcombine.high %v1925_v9, %v1932_v42  ;;  %v3509_v1 = vld [vmem:[%s3604_s6] sm:$0xff] }
 0x5c4   :  { %v1977_v10 = vrot.slane %v1969_v16, %v3118_v53  ;;  %v1993_v45 = vrot.slane %v1985_v17, %v3118_v53  ;;  %v1984_v12 = vrot.slane %v1970_v43, %v3118_v53  ;;  %v2000_v13 = vrot.slane %v1986_v14, %v3118_v53 }
 0x5c5   :  { %v2012_v19 = vrot.slane %v2005_v18, %v3115_v46  ;;  %v2020_v23 = vrot.slane %v2570_v5, %v3115_v46  ;;  %v2028_v11 = vrot.slane %v2021_v6, %v3115_v46  ;;  %v2036_v37 = vrot.slane %v2571_v35, %v3115_v46 }
 0x5c6   :  { %v2001_v54 = vcombine.low %v1977_v10, %v1993_v45  ;;  %v2003_v44 = vcombine.low %v1984_v12, %v2000_v13  ;;  %v2002_v47 = vcombine.high %v1977_v10, %v1993_v45  ;;  %v2112_v0 = vsub.s32 6, %v3005_v26 }
 0x5c7   :  { %v2038_v25 = vcombine.high %v2012_v19, %v2020_v23  ;;  %v2054_v27 = vcombine.high %v2028_v11, %v2036_v37  ;;  %v2037_v30 = vcombine.low %v2012_v19, %v2020_v23  ;;  %v2053_v24 = vcombine.low %v2028_v11, %v2036_v37 }
 0x5c8   :  { %v2113_v9 = vrot.slane %v3509_v1, %v2112_v0  ;;  %v2170_v14 = vmul.f32 1.4142135, %v3014_v38  ;;  %v2171_v35 = vmul.f32 1.4142135, %v3016_v39  ;;  %v2832_v39 = vld [vmem:[%s3611_s9 + $0x8] sm:$0xff]  }
 0x5c9   :  { %v2052_v31 = vrot.slane %v2038_v25, %v3118_v53  ;;  %v2068_v46 = vrot.slane %v2054_v27, %v3118_v53  ;;  %v2045_v32 = vrot.slane %v2037_v30, %v3118_v53  ;;  %v2061_v33 = vrot.slane %v2053_v24, %v3118_v53  ;;  %2760 = vmatpush3.bf16.msra.mxu0 %v2832_v39  ;;  %v2833_v30 = vld [vmem:[%s3611_s9] sm:$0xff]  }
 0x5ca   :  { %v2004_v53 = vcombine.high %v1984_v12, %v2000_v13  ;;  %2761 = vmatprep.subr.bf16.mxu0 %v2893_v15 }
 0x5cb   :  { %v2071_v29 = vcombine.low %v2052_v31, %v2068_v46  ;;  %v2070_v48 = vcombine.high %v2045_v32, %v2061_v33  ;;  %v2069_v49 = vcombine.low %v2045_v32, %v2061_v33  ;;  %v2072_v4 = vcombine.high %v2052_v31, %v2068_v46 }
 0x5cd   :  { %v2810_v50 = vpack.i.bf16 %v2071_v29, %v2003_v44  ;;  %v2805_v51 = vpack.i.bf16 %v2070_v48, %v2002_v47  ;;  %v2815_v20 = vpack.i.bf16 %v2072_v4, %v2004_v53  ;;  %2762 = vmatpush3.bf16.msra.mxu0 %v2833_v30  ;;  %v2203_v44 = vrot.slane %v3509_v1, %v229_v58  ;;  %v2835_v58 = vld [vmem:[%s3612_s11 + $0x30] sm:$0xff]  }
 0x5ce   :  { %2787 = vmatprep.subr.bf16.mxu0 %v2893_v15  ;;  %v2209_v47 = vrot.slane %v3509_v1, %v291_v55  ;;  %v2834_v55 = vld [vmem:[%s3612_s11 + $0x38] sm:$0xff]  }
 0x5cf   :  { %2811 = vrot.lane.b32.xlu1 %v2810_v50, %s2900_s4  ;;  %2806 = vrot.lane.b32.xlu0 %v2805_v51, %s2901_s22 }
 0x5d3   :  { %2816 = vrot.lane.b32.xlu1 %v2815_v20, %s2902_s23 }
 0x641   :  { %v2812_v21 = vpop.permute.xlu1 %2811  ;;  %v2807_v40 = vpop.permute.xlu0 %2806 }
 0x642   :  { %v2809_v52 = vunpack.i.h.bf16 %v2807_v40  ;;  %v2808_v57 = vunpack.i.l.bf16 %v2807_v40  ;;  %v2814_v56 = vunpack.i.h.bf16 %v2812_v21  ;;  %v2813_v28 = vunpack.i.l.bf16 %v2812_v21  ;;  %v2836_v40 = vld [vmem:[%s3612_s11 + $0x28] sm:$0xff]  }
 0x644   :  { %v2097_v60 = vsel %vm1324_vm2, %v2001_v54, %v2808_v57  ;;  %v2098_v61 = vsel %vm1324_vm2, %v2069_v49, %v2809_v52  ;;  %v2837_v52 = vld [vmem:[%s3612_s11 + $0x20] sm:$0xff]   ;;  %v2838_v57 = vld [vmem:[%s3612_s11 + $0x18] sm:$0xff]  }
 0x645   :  { %v2817_v22 = vpop.permute.xlu1 %2816  ;;  %v2100_v7 = vsel %vm2099_vm3, %v2097_v60, %v2813_v28  ;;  %v2101_v8 = vsel %vm2099_vm3, %v2098_v61, %v2814_v56  ;;  %v2839_v56 = vld [vmem:[%s3612_s11 + $0x10] sm:$0xff]   ;;  %v2840_v28 = vld [vmem:[%s3612_s11 + $0x8] sm:$0xff]   ;;  %v2841_v60 = vld [vmem:[%s3612_s11] sm:$0xff]  }
 0x646   :  { %v2819_v2 = vunpack.i.h.bf16 %v2817_v22  ;;  %v2818_v3 = vunpack.i.l.bf16 %v2817_v22  ;;  %v2575_v61 = vld [vmem:[%s3613_s10] ss:$0 sm:$0xff] }
 0x648   :  { %v2103_v62 = vsel %vm2102_vm4, %v2100_v7, %v2818_v3  ;;  %v2104_v63 = vsel %vm2102_vm4, %v2101_v8, %v2819_v2 }
 0x649   :  { %v2105_v59 = vpack.c.bf16 %v2104_v63, %v2103_v62 }
 0x64b   :  { %2756 = vmatmul.mubr.msk.bf16.vlgmr.msra.gmra.mxu1 %vm55_vm0, %v2105_v59 }
 0x64c   :  { %2783 = vmatprep.mubr.msk.bf16.mxu1 %vm2894_vm1, %v2893_v15  ;;  %2768 = vmatpush3.bf16.msra.mxu1 %v2834_v55 }
 0x64d   :  { %2769 = vmatprep.subr.bf16.mxu1 %v2893_v15 }
 0x650   :  { %2770 = vmatpush3.bf16.msra.mxu1 %v2835_v58 }
 0x651   :  { %2771 = vmatprep.subr.bf16.mxu1 %v2893_v15 }
 0x654   :  { %2772 = vmatpush3.bf16.msra.mxu1 %v2836_v40 }
 0x655   :  { %2773 = vmatprep.subr.bf16.mxu1 %v2893_v15 }
 0x658   :  { %2774 = vmatpush3.bf16.msra.mxu1 %v2837_v52 }
 0x659   :  { %2775 = vmatprep.subr.bf16.mxu1 %v2893_v15 }
 0x65c   :  { %2776 = vmatpush3.bf16.msra.mxu1 %v2838_v57 }
 0x65d   :  { %2777 = vmatprep.subr.bf16.mxu1 %v2893_v15 }
 0x660   :  { %2778 = vmatpush3.bf16.msra.mxu1 %v2839_v56 }
 0x661   :  { %2779 = vmatprep.subr.bf16.mxu1 %v2893_v15 }
 0x664   :  { %2780 = vmatpush3.bf16.msra.mxu1 %v2840_v28 }
 0x665   :  { %2781 = vmatprep.subr.bf16.mxu1 %v2893_v15 }
 0x668   :  { %2782 = vmatpush3.bf16.msra.mxu1 %v2841_v60  ;;  %v2441_v60 = vrot.slane %v3509_v1, %v353_v36 }
 0x70b   :  { %v2163_v42 = vpop.f32.mrf.mxu1 }
 0x70c   :  { %v2164_v43 = vadd.f32 %v2163_v42, %v2113_v9 }
 0x70d   :  { %v2757_v16 = vpop.f32.mrf.mxu1 }
 0x70e   :  { %v2172_v17 = vadd.f32 %v2170_v14, %v2164_v43 }
 0x70f   :  { %v2166_v18 = vpop.f32.mrf.mxu1 }
 0x710   :  { %v2167_v5 = vadd.f32 %v2166_v18, %v2113_v9  ;;  %v2174_v6 = vsel %vm55_vm0, %v2172_v17, 0.0 }
 0x711   :  { %2175 = vadd.xlane.f32.xlu1 %v2174_v6  ;;  %v2758_v10 = vpop.f32.mrf.mxu1 }
 0x712   :  { %v2173_v45 = vadd.f32 %v2171_v35, %v2167_v5 }
 0x714   :  { %v2177_v19 = vsel %vm55_vm0, %v2173_v45, 0.0 }
 0x715   :  { %2178 = vadd.xlane.f32.xlu0 %v2177_v19 }
 0x79a   :  { %v2176_v23 = vpop.xlane.xlu1 %2175 }
 0x79b   :  { %v2180_v11 = vmul.f32 0.03125, %v2176_v23 }
 0x79d   :  { %v2182_v37 = vsub.f32 %v2172_v17, %v2180_v11 }
 0x79e   :  { %v2179_v41 = vpop.xlane.xlu0 %2178 }
 0x79f   :  { %v2181_v12 = vmul.f32 0.03125, %v2179_v41  ;;  %v2184_v38 = vmul.f32 %v2182_v37, %v2182_v37  ;;  %v2317_v41 = vsub.s32 7, %v3005_v26 }
 0x7a1   :  { %v2183_v13 = vsub.f32 %v2173_v45, %v2181_v12  ;;  %v2186_v54 = vsel %vm55_vm0, %v2184_v38, 0.0  ;;  %v2318_v12 = vrot.slane %v3509_v1, %v2317_v41 }
 0x7a2   :  { %2187 = vadd.xlane.f32.xlu0 %v2186_v54 }
 0x7a3   :  { %v2185_v25 = vmul.f32 %v2183_v13, %v2183_v13 }
 0x7a5   :  { %v2189_v27 = vsel %vm55_vm0, %v2185_v25, 0.0 }
 0x7a6   :  { %2190 = vadd.xlane.f32.xlu0 %v2189_v27 }
 0x82b   :  { %v2188_v24 = vpop.xlane.xlu0 %2187 }
 0x82c   :  { %v2192_v31 = vmul.f32 0.03125, %v2188_v24 }
 0x82e   :  { %v2194_v46 = vadd.f32 1e-05, %v2192_v31 }
 0x82f   :  { %v2191_v32 = vpop.xlane.xlu0 %2190 }
 0x830   :  { %2880 = vrsqrt.f32 %v2194_v46  ;;  %v2193_v33 = vmul.f32 0.03125, %v2191_v32 }
 0x832   :  { %v2195_v34 = vadd.f32 1e-05, %v2193_v33 }
 0x834   :  { %2882 = vrsqrt.f32 %v2195_v34 }
 0x83d   :  { %v2881_v29 = vpop.eup %2880 }
 0x83e   :  { %v2198_v48 = vmul.f32 %v2881_v29, %v2182_v37 }
 0x840   :  { %v2204_v49 = vmul.f32 %v2203_v44, %v2198_v48 }
 0x841   :  { %v2883_v50 = vpop.eup %2882 }
 0x842   :  { %v2199_v51 = vmul.f32 %v2883_v50, %v2183_v13  ;;  %v3532_v4 = vadd.f32 %v2209_v47, %v2204_v49 }
 0x844   :  { %v2205_v53 = vmul.f32 %v2203_v44, %v2199_v51  ;;  %v2408_v54 = vmul.f32 1.4142135, %v3532_v4 }
 0x846   :  { %v3534_v20 = vadd.f32 %v2209_v47, %v2205_v53 }
 0x848   :  { %v2212_v21 = vpack.c.bf16 %v3534_v20, %v3532_v4  ;;  %v2409_v31 = vmul.f32 1.4142135, %v3534_v20  ;;  %v2842_v20 = vld [vmem:[%s3614_s12 + $0x8] sm:$0xff]  }
 0x84a   :  { %2764 = vmatmul.mubr.msk.bf16.vlgmr.msra.gmra.mxu0 %vm55_vm0, %v2212_v21  ;;  %v2843_v21 = vld [vmem:[%s3614_s12] sm:$0xff]  }
 0x84b   :  { %2791 = vmatprep.mubr.msk.bf16.mxu0 %vm2894_vm1, %v2893_v15  ;;  %2788 = vmatpush3.bf16.msra.mxu0 %v2842_v20 }
 0x84c   :  { %2789 = vmatprep.subr.bf16.mxu0 %v2893_v15 }
 0x84f   :  { %2790 = vmatpush3.bf16.msra.mxu0 %v2843_v21 }
 0x90a   :  { %v2273_v22 = vpop.f32.mrf.mxu0 }
 0x90b   :  { %v2274_v2 = vadd.f32 %v2575_v61, %v2273_v22  ;;  %v2446_v22 = vsub.s32 5, %v3005_v26 }
 0x90c   :  { %v2765_v3 = vpop.f32.mrf.mxu0 }
 0x90d   :  { %v2280_v7 = vmul.f32 %v2274_v2, %v2274_v2 }
 0x90e   :  { %v2276_v8 = vpop.f32.mrf.mxu0 }
 0x90f   :  { %v2282_v62 = vmul.f32 %v2280_v7, %v2274_v2  ;;  %v2277_v63 = vadd.f32 %v2575_v61, %v2276_v8  ;;  %v2447_v7 = vrot.slane %v3509_v1, %v2446_v22 }
 0x910   :  { %v2766_v59 = vpop.f32.mrf.mxu0 }
 0x911   :  { %v2284_v0 = vmul.f32 0.044715, %v2282_v62  ;;  %v2281_v9 = vmul.f32 %v2277_v63, %v2277_v63 }
 0x913   :  { %v2286_v42 = vadd.f32 %v2284_v0, %v2274_v2  ;;  %v2283_v43 = vmul.f32 %v2281_v9, %v2277_v63 }
 0x915   :  { %v2288_v14 = vmul.f32 0.7978846, %v2286_v42  ;;  %v2285_v16 = vmul.f32 0.044715, %v2283_v43 }
 0x917   :  { %2884 = vtanh.f32 %v2288_v14  ;;  %v2287_v17 = vadd.f32 %v2285_v16, %v2277_v63 }
 0x919   :  { %v2289_v18 = vmul.f32 0.7978846, %v2287_v17 }
 0x91b   :  { %2886 = vtanh.f32 %v2289_v18 }
 0x924   :  { %v2885_v5 = vpop.eup %2884 }
 0x925   :  { %v2292_v6 = vadd.f32 1.0, %v2885_v5 }
 0x927   :  { %v2294_v10 = vmul.f32 0.5, %v2292_v6 }
 0x928   :  { %v2887_v35 = vpop.eup %2886 }
 0x929   :  { %v2293_v45 = vadd.f32 1.0, %v2887_v35  ;;  %v2296_v23 = vmul.f32 %v2294_v10, %v2274_v2 }
 0x92b   :  { %v2295_v19 = vmul.f32 0.5, %v2293_v45 }
 0x92d   :  { %v2297_v11 = vmul.f32 %v2295_v19, %v2277_v63 }
 0x92f   :  { %v2298_v37 = vpack.c.bf16 %v2297_v11, %v2296_v23 }
 0x931   :  { %2784 = vmatmul.mubr.bf16.vlgmr.msra.gmra.mxu1 %v2298_v37 }
 0x9f1   :  { %v2401_v38 = vpop.f32.mrf.mxu1 }
 0x9f2   :  { %v2402_v13 = vadd.f32 %v2401_v38, %v2318_v12 }
 0x9f3   :  { %v2785_v25 = vpop.f32.mrf.mxu1 }
 0x9f4   :  { %v2410_v27 = vadd.f32 %v2408_v54, %v2402_v13 }
 0x9f5   :  { %v2404_v39 = vpop.f32.mrf.mxu1 }
 0x9f6   :  { %v2405_v30 = vadd.f32 %v2404_v39, %v2318_v12  ;;  %v2412_v24 = vsel %vm55_vm0, %v2410_v27, 0.0 }
 0x9f7   :  { %2413 = vadd.xlane.f32.xlu1 %v2412_v24  ;;  %v2786_v46 = vpop.f32.mrf.mxu1 }
 0x9f8   :  { %v2411_v32 = vadd.f32 %v2409_v31, %v2405_v30 }
 0x9fa   :  { %v2415_v33 = vsel %vm55_vm0, %v2411_v32, 0.0 }
 0x9fb   :  { %2416 = vadd.xlane.f32.xlu0 %v2415_v33 }
 0xa80   :  { %v2414_v34 = vpop.xlane.xlu1 %2413 }
 0xa81   :  { %v2418_v44 = vmul.f32 0.03125, %v2414_v34 }
 0xa83   :  { %v2420_v29 = vsub.f32 %v2410_v27, %v2418_v44 }
 0xa84   :  { %v2417_v47 = vpop.xlane.xlu0 %2416 }
 0xa85   :  { %v2419_v48 = vmul.f32 0.03125, %v2417_v47  ;;  %v2422_v49 = vmul.f32 %v2420_v29, %v2420_v29 }
 0xa87   :  { %v2421_v50 = vsub.f32 %v2411_v32, %v2419_v48  ;;  %v2424_v51 = vsel %vm55_vm0, %v2422_v49, 0.0 }
 0xa88   :  { %2425 = vadd.xlane.f32.xlu1 %v2424_v51 }
 0xa89   :  { %v2423_v4 = vmul.f32 %v2421_v50, %v2421_v50 }
 0xa8b   :  { %v2427_v53 = vsel %vm55_vm0, %v2423_v4, 0.0 }
 0xa8c   :  { %2428 = vadd.xlane.f32.xlu0 %v2427_v53 }
 0xb11   :  { %v2426_v55 = vpop.xlane.xlu1 %2425 }
 0xb12   :  { %v2430_v58 = vmul.f32 0.03125, %v2426_v55 }
 0xb14   :  { %v2432_v40 = vadd.f32 1e-05, %v2430_v58 }
 0xb15   :  { %v2429_v52 = vpop.xlane.xlu0 %2428 }
 0xb16   :  { %2888 = vrsqrt.f32 %v2432_v40  ;;  %v2431_v57 = vmul.f32 0.03125, %v2429_v52 }
 0xb18   :  { %v2433_v56 = vadd.f32 1e-05, %v2431_v57 }
 0xb1a   :  { %2890 = vrsqrt.f32 %v2433_v56 }
 0xb23   :  { %v2889_v28 = vpop.eup %2888 }
 0xb24   :  { %v2436_v61 = vmul.f32 %v2889_v28, %v2420_v29 }
 0xb26   :  { %v2442_v15 = vmul.f32 %v2441_v60, %v2436_v61 }
 0xb27   :  { %v2891_v2 = vpop.eup %2890 }
 0xb28   :  { %v2437_v3 = vmul.f32 %v2891_v2, %v2421_v50  ;;  %v2448_v62 = vadd.f32 %v2447_v7, %v2442_v15 }
 0xb2a   :  { %v2443_v8 = vmul.f32 %v2441_v60, %v2437_v3 }
 0xb2c   :  { %v2449_v63 = vadd.f32 %v2447_v7, %v2443_v8 }
 0xb2e   :  { %v2450_v59 = vpack.c.bf16 %v2449_v63, %v2448_v62 }
 0xb30   :  { %2792 = vmatmul.mubr.msk.bf16.vlgmr.msra.gmra.mxu0 %vm55_vm0, %v2450_v59 }
 0xbf0   :  { %v2504_v0 = vpop.f32.mrf.mxu0 }
 0xbf1   :  { %2511 = vst [vmem:[%s3615_s13] sm:$0xff] %v2504_v0 }
 0xbf2   :  { %v2793_v36 = vpop.f32.mrf.mxu0 }
 0xbf4   :  { %v2507_v9 = vpop.f32.mrf.mxu0 }
 0xbf5   :  { %2512 = vst [vmem:[%s3615_s13 + $0x8] sm:$0xff] %v2507_v9 }
 0xbf6   :  { %v2794_v26 = vpop.f32.mrf.mxu0 }

</bundles_post_ra>
